<compile_context>
chip_gen: v6e
topology: v6e:2x2x1
jax: 0.10.0
libtpu: 0.0.40
codegen_flags: <defaults>
</compile_context>

<pallas_src>
import jax
import jax.numpy as jnp
from jax.experimental import pallas as pl
from jax.experimental.pallas import tpu as pltpu


def _round_up(x: int, m: int) -> int:
    return ((x + m - 1) // m) * m


def uav_mlp_kernel(x_ref, w1_ref, b1_ref, w2_ref, b2_ref, w3_ref, b3_ref, o_ref):
    # fc1 + relu   (K = state_dim is tiny; MXU has plenty of slack here since the
    # kernel is dominated by the state/out stream. TODO(synk): optionally replace
    # with an unrolled VPU outer-product if fc1 MXU occupancy ever matters.)
    h1 = jnp.dot(x_ref[...], w1_ref[...], preferred_element_type=jnp.float32)
    h1 = jnp.maximum(h1 + b1_ref[...], 0.0)
    # fc2 + relu
    h2 = jnp.dot(h1.astype(jnp.bfloat16), w2_ref[...],
                 preferred_element_type=jnp.float32)
    h2 = jnp.maximum(h2 + b2_ref[...], 0.0)
    # fc3 (no activation) — output tile is lane-dense (padded to 128 lanes)
    out = jnp.dot(h2.astype(jnp.bfloat16), w3_ref[...],
                  preferred_element_type=jnp.float32)
    o_ref[...] = (out + b3_ref[...]).astype(o_ref.dtype)


def uav_agent_forward(state, params, *, tb=512):
    """state: (B, state_dim) f32. params: dict of w1,b1,w2,b2,w3,b3 (f32)."""
    B, state_dim = state.shape
    hidden = params["w1"].shape[1]
    action_dim = params["w3"].shape[1]
    out_pad = _round_up(action_dim, 128)  # lane-dense output width

    # Pad fc3 to a 128-wide output; padded lanes are zero and never leak
    # (they are sliced off below).
    w3p = jnp.zeros((hidden, out_pad), jnp.float32).at[:, :action_dim].set(params["w3"])
    b3p = jnp.zeros((1, out_pad), jnp.float32).at[:, :action_dim].set(params["b3"])

    # bf16 MXU inputs, f32 biases / accumulation.
    w1 = params["w1"].astype(jnp.bfloat16)
    w2 = params["w2"].astype(jnp.bfloat16)
    w3p = w3p.astype(jnp.bfloat16)
    b1 = params["b1"].astype(jnp.float32)
    b2 = params["b2"].astype(jnp.float32)
    b3p = b3p.astype(jnp.float32)

    # Batch tile: multiple of 128 rows (MXU row-dense), capped at `tb`.
    # Footprint per step (TB=512): ~8 KB state(bf16) + ~256 KB out(f32), double-
    # buffered, plus ~20 KB resident weights — far under the 16 MiB v5e scoped
    # VMEM default, so no vmem_limit_bytes override is needed.
    tb = min(tb, _round_up(B, 128))
    b_pad = _round_up(B, tb)

    x = state.astype(jnp.bfloat16)
    if b_pad != B:
        x = jnp.pad(x, ((0, b_pad - B), (0, 0)))

    grid = (b_pad // tb,)
    out = pl.pallas_call(
        uav_mlp_kernel,
        out_shape=jax.ShapeDtypeStruct((b_pad, out_pad), jnp.float32),
        grid_spec=pltpu.PrefetchScalarGridSpec(
            num_scalar_prefetch=0,
            grid=grid,
            in_specs=[
                # state tile moves with the grid
                pl.BlockSpec((tb, state_dim), lambda i: (i, 0)),
                # weights / biases: constant block index -> loaded once, resident
                pl.BlockSpec((state_dim, hidden), lambda i: (0, 0)),
                pl.BlockSpec((1, hidden), lambda i: (0, 0)),
                pl.BlockSpec((hidden, hidden), lambda i: (0, 0)),
                pl.BlockSpec((1, hidden), lambda i: (0, 0)),
                pl.BlockSpec((hidden, out_pad), lambda i: (0, 0)),
                pl.BlockSpec((1, out_pad), lambda i: (0, 0)),
            ],
            out_specs=pl.BlockSpec((tb, out_pad), lambda i: (i, 0)),
        ),
        compiler_params=pltpu.CompilerParams(
            dimension_semantics=("parallel",),  # megacore-shardable on v7x
        ),
    )(x, w1, b1, w2, b2, w3p, b3p)

    return out[:B, :action_dim]


def init_params(key, state_dim, action_dim, hidden=64):
    """Deterministic synthetic parameters (same shapes as the PyTorch module)."""
    ks = jax.random.split(key, 6)

    # Match PyTorch nn.Linear default init scale (U(-1/sqrt(fan_in), 1/sqrt(fan_in))).
    def lin(kw, kb, fan_in, fan_out):
        bound = 1.0 / jnp.sqrt(fan_in)
        w = jax.random.uniform(kw, (fan_in, fan_out), jnp.float32, -bound, bound)
        b = jax.random.uniform(kb, (1, fan_out), jnp.float32, -bound, bound)
        return w, b

    w1, b1 = lin(ks[0], ks[1], state_dim, hidden)
    w2, b2 = lin(ks[2], ks[3], hidden, hidden)
    w3, b3 = lin(ks[4], ks[5], hidden, action_dim)
    return {"w1": w1, "b1": b1, "w2": w2, "b2": b2, "w3": w3, "b3": b3}


if __name__ == "__main__":
    key = jax.random.PRNGKey(0)
    k_params, k_state = jax.random.split(key)

    # Batch large enough to exercise a multi-step grid and the pad/slice path
    # (1000 rows -> TB=512, padded to 1024, grid=(2,)), still tiny in memory.
    batch = 1000
    state_dim = 8
    action_dim = 4

    params = init_params(k_params, state_dim, action_dim)
    state = jax.random.normal(k_state, (batch, state_dim), jnp.float32)

    out = uav_agent_forward(state, params)
    out = jax.block_until_ready(out)

    # Reference with the same mixed precision (bf16 MXU inputs, f32 accumulate).
    def ref(x, p):
        bf = jnp.bfloat16
        h = jnp.maximum(
            jnp.dot(x.astype(bf), p["w1"].astype(bf),
                    preferred_element_type=jnp.float32) + p["b1"], 0.0)
        h = jnp.maximum(
            jnp.dot(h.astype(bf), p["w2"].astype(bf),
                    preferred_element_type=jnp.float32) + p["b2"], 0.0)
        return jnp.dot(h.astype(bf), p["w3"].astype(bf),
                       preferred_element_type=jnp.float32) + p["b3"]

    expected = ref(state, params)
    assert out.shape == (batch, action_dim)
    assert jnp.allclose(out, expected, atol=2e-3, rtol=2e-3), (
        float(jnp.max(jnp.abs(out - expected))))

    # Sanity vs. full-f32 math (bf16 rounding only).
    def ref_f32(x, p):
        h = jnp.maximum(x @ p["w1"] + p["b1"], 0.0)
        h = jnp.maximum(h @ p["w2"] + p["b2"], 0.0)
        return h @ p["w3"] + p["b3"]

    assert jnp.allclose(out, ref_f32(state, params), atol=5e-2, rtol=5e-2)

    print("KERNEL_OK")
</pallas_src>

<mosaic_0001>
module attributes {stable_mosaic.version = 11 : i64} {
  func.func @uav_mlp_kernel(%arg0: i32, %arg1: memref<512x8xbf16, #tpu.memory_space<vmem>>, %arg2: memref<8x64xbf16, #tpu.memory_space<vmem>>, %arg3: memref<1x64xf32, #tpu.memory_space<vmem>>, %arg4: memref<64x64xbf16, #tpu.memory_space<vmem>>, %arg5: memref<1x64xf32, #tpu.memory_space<vmem>>, %arg6: memref<64x128xbf16, #tpu.memory_space<vmem>>, %arg7: memref<1x128xf32, #tpu.memory_space<vmem>>, %arg8: memref<512x128xf32, #tpu.memory_space<vmem>>) attributes {dimension_semantics = [#tpu.dimension_semantics<parallel>], iteration_bounds = array<i64: 2>, scalar_prefetch = 0 : i64, scratch_operands = 0 : i64, tpu.core_type = #tpu.core_type<tc>, window_params = [{transform_indices = @transform_0, window_bounds = array<i64: 512, 8>}, {pipeline_mode = #tpu.pipeline_mode<synchronous>, transform_indices = @transform_1, window_bounds = array<i64: 8, 64>}, {pipeline_mode = #tpu.pipeline_mode<synchronous>, transform_indices = @transform_2, window_bounds = array<i64: 1, 64>}, {pipeline_mode = #tpu.pipeline_mode<synchronous>, transform_indices = @transform_3, window_bounds = array<i64: 64, 64>}, {pipeline_mode = #tpu.pipeline_mode<synchronous>, transform_indices = @transform_4, window_bounds = array<i64: 1, 64>}, {pipeline_mode = #tpu.pipeline_mode<synchronous>, transform_indices = @transform_5, window_bounds = array<i64: 64, 128>}, {pipeline_mode = #tpu.pipeline_mode<synchronous>, transform_indices = @transform_6, window_bounds = array<i64: 1, 128>}, {transform_indices = @transform_7, window_bounds = array<i64: 512, 128>}]} {
    %c0 = arith.constant 0 : index
    %c0_0 = arith.constant 0 : index
    %0 = vector.load %arg1[%c0, %c0_0] : memref<512x8xbf16, #tpu.memory_space<vmem>>, vector<512x8xbf16>
    %c0_1 = arith.constant 0 : index
    %c0_2 = arith.constant 0 : index
    %1 = vector.load %arg2[%c0_1, %c0_2] : memref<8x64xbf16, #tpu.memory_space<vmem>>, vector<8x64xbf16>
    %cst = arith.constant dense<0.000000e+00> : vector<512x64xf32>
    %2 = tpu.matmul %0, %1, %cst {dimension_numbers = #tpu.dot_dimension_numbers<[1], [0], [0], [1], [0, 0, 1, 1], [], []>} : vector<512x8xbf16>, vector<8x64xbf16>, vector<512x64xf32> -> vector<512x64xf32>
    %c0_3 = arith.constant 0 : index
    %c0_4 = arith.constant 0 : index
    %3 = vector.load %arg3[%c0_3, %c0_4] : memref<1x64xf32, #tpu.memory_space<vmem>>, vector<1x64xf32>
    %4 = vector.broadcast %3 : vector<1x64xf32> to vector<512x64xf32>
    %5 = arith.addf %2, %4 : vector<512x64xf32>
    %cst_5 = arith.constant 0.000000e+00 : f32
    %6 = vector.broadcast %cst_5 : f32 to vector<512x64xf32>
    %7 = arith.maximumf %5, %6 : vector<512x64xf32>
    %8 = arith.truncf %7 : vector<512x64xf32> to vector<512x64xbf16>
    %c0_6 = arith.constant 0 : index
    %c0_7 = arith.constant 0 : index
    %9 = vector.load %arg4[%c0_6, %c0_7] : memref<64x64xbf16, #tpu.memory_space<vmem>>, vector<64x64xbf16>
    %cst_8 = arith.constant dense<0.000000e+00> : vector<512x64xf32>
    %10 = tpu.matmul %8, %9, %cst_8 {dimension_numbers = #tpu.dot_dimension_numbers<[1], [0], [0], [1], [0, 0, 1, 1], [], []>} : vector<512x64xbf16>, vector<64x64xbf16>, vector<512x64xf32> -> vector<512x64xf32>
    %c0_9 = arith.constant 0 : index
    %c0_10 = arith.constant 0 : index
    %11 = vector.load %arg5[%c0_9, %c0_10] : memref<1x64xf32, #tpu.memory_space<vmem>>, vector<1x64xf32>
    %12 = vector.broadcast %11 : vector<1x64xf32> to vector<512x64xf32>
    %13 = arith.addf %10, %12 : vector<512x64xf32>
    %cst_11 = arith.constant 0.000000e+00 : f32
    %14 = vector.broadcast %cst_11 : f32 to vector<512x64xf32>
    %15 = arith.maximumf %13, %14 : vector<512x64xf32>
    %16 = arith.truncf %15 : vector<512x64xf32> to vector<512x64xbf16>
    %c0_12 = arith.constant 0 : index
    %c0_13 = arith.constant 0 : index
    %17 = vector.load %arg6[%c0_12, %c0_13] : memref<64x128xbf16, #tpu.memory_space<vmem>>, vector<64x128xbf16>
    %cst_14 = arith.constant dense<0.000000e+00> : vector<512x128xf32>
    %18 = tpu.matmul %16, %17, %cst_14 {dimension_numbers = #tpu.dot_dimension_numbers<[1], [0], [0], [1], [0, 0, 1, 1], [], []>} : vector<512x64xbf16>, vector<64x128xbf16>, vector<512x128xf32> -> vector<512x128xf32>
    %c0_15 = arith.constant 0 : index
    %c0_16 = arith.constant 0 : index
    %19 = vector.load %arg7[%c0_15, %c0_16] : memref<1x128xf32, #tpu.memory_space<vmem>>, vector<1x128xf32>
    %20 = vector.broadcast %19 : vector<1x128xf32> to vector<512x128xf32>
    %21 = arith.addf %18, %20 : vector<512x128xf32>
    %c0_17 = arith.constant 0 : index
    %c0_18 = arith.constant 0 : index
    %22 = vector.load %arg8[%c0_17, %c0_18] : memref<512x128xf32, #tpu.memory_space<vmem>>, vector<512x128xf32>
    tpu.vector_store %arg8[%c0_17, %c0_18], %21 {strides = array<i32>} : memref<512x128xf32, #tpu.memory_space<vmem>>, vector<512x128xf32>,
    return
  }
  func.func @transform_0(%arg0: i32) -> (i32, i32) {
    %c0_i32 = arith.constant 0 : i32
    %c0_i32_0 = arith.constant 0 : i32
    return %arg0, %c0_i32 : i32, i32
  }
  func.func @transform_1(%arg0: i32) -> (i32, i32) {
    %c0_i32 = arith.constant 0 : i32
    %c0_i32_0 = arith.constant 0 : i32
    %c0_i32_1 = arith.constant 0 : i32
    return %c0_i32, %c0_i32_0 : i32, i32
  }
  func.func @transform_2(%arg0: i32) -> (i32, i32) {
    %c0_i32 = arith.constant 0 : i32
    %c0_i32_0 = arith.constant 0 : i32
    %c0_i32_1 = arith.constant 0 : i32
    return %c0_i32, %c0_i32_0 : i32, i32
  }
  func.func @transform_3(%arg0: i32) -> (i32, i32) {
    %c0_i32 = arith.constant 0 : i32
    %c0_i32_0 = arith.constant 0 : i32
    %c0_i32_1 = arith.constant 0 : i32
    return %c0_i32, %c0_i32_0 : i32, i32
  }
  func.func @transform_4(%arg0: i32) -> (i32, i32) {
    %c0_i32 = arith.constant 0 : i32
    %c0_i32_0 = arith.constant 0 : i32
    %c0_i32_1 = arith.constant 0 : i32
    return %c0_i32, %c0_i32_0 : i32, i32
  }
  func.func @transform_5(%arg0: i32) -> (i32, i32) {
    %c0_i32 = arith.constant 0 : i32
    %c0_i32_0 = arith.constant 0 : i32
    %c0_i32_1 = arith.constant 0 : i32
    return %c0_i32, %c0_i32_0 : i32, i32
  }
  func.func @transform_6(%arg0: i32) -> (i32, i32) {
    %c0_i32 = arith.constant 0 : i32
    %c0_i32_0 = arith.constant 0 : i32
    %c0_i32_1 = arith.constant 0 : i32
    return %c0_i32, %c0_i32_0 : i32, i32
  }
  func.func @transform_7(%arg0: i32) -> (i32, i32) {
    %c0_i32 = arith.constant 0 : i32
    %c0_i32_0 = arith.constant 0 : i32
    return %arg0, %c0_i32 : i32, i32
  }
}

</mosaic_0001>

<bundles_post_ra>
// kernel: tpu_custom_call.1
= control target key start
LH: loop header
LB: loop body
LE: loop exit
PB: predicated region body
PF: predicated region fallthrough
CT: control target
= control target key end

     0   :  { %12 = vsyncpa [#allocation3], 0  ;;  %s3337_s0 = inlined_call_operand.vmem [shape: bf16[1024,8], index: 0, kind: input, shape index: {}]   ;;  %s3338_s1 = inlined_call_operand.vmem [shape: bf16[8,64], index: 1, kind: input, shape index: {}]   ;;  %s3339_s2 = inlined_call_operand.vmem [shape: f32[1,64], index: 2, kind: input, shape index: {}]   ;;  %s3340_s3 = inlined_call_operand.vmem [shape: bf16[64,64], index: 3, kind: input, shape index: {}]   ;;  %s3341_s4 = inlined_call_operand.vmem [shape: f32[1,64], index: 4, kind: input, shape index: {}]   ;;  %s3342_s5 = inlined_call_operand.vmem [shape: bf16[64,128], index: 5, kind: input, shape index: {}]   ;;  %s3343_s6 = inlined_call_operand.vmem [shape: f32[1,128], index: 6, kind: input, shape index: {}]   ;;  %s3344_s7 = inlined_call_operand.hbm [shape: f32[1024,128], index: 7, kind: output, shape index: {}]  }
   0x1   :  { %14 = vsyncpa [#allocation3 + $0x1], 0  ;;  %s2741_s24 = smov 0   ;;  %s2743_s25 = smov 0  }
   0x2   :  { %s2745_s26 = smov 0   ;;  %s2747_s27 = smov 0  }
   0x3 LB: > { %s2762_s28 = sadd.s32 4294967295, %s2696_s27   ;;  %s2084_s29 = sadd.s32 4294967294, %s2696_s27   ;;  %s2696_s27 = sphi %s2747_s27, %s3350_s27   ;;  %s2692_s26 = sphi %s2745_s26, %s3349_s26   ;;  %s2688_s25 = sphi %s2743_s25, %s3348_s25   ;;  %s2684_s24 = sphi %s2741_s24, %s3347_s24  }
   0x4   : > { %s2766_s30 = sadd.s32 1, %s2696_s27   ;;  %s179_s8 = sadd.s32 1, %s2692_s26 }
   0x5   : > { %s176_s9 = ssub.s32 %s2696_s27, %s2766_s30  ;;  %p189_p0 = scmp.ne.s32.totalorder %s2692_s26, %s2688_s25 }
   0x6   : > { %p177_p1 = scmp.eq.s32.totalorder %s176_s9, 0  ;;  %p190_p2 = scmp.eq.s32.totalorder %s2762_s28, 1 }
   0x7   : > { %p195_p3 = scmp.ne.s32.totalorder %s2688_s25, %s2684_s24  ;;  %p196_p4 = scmp.eq.s32.totalorder %s2084_s29, 1 }
   0x8   : > { %s2777_s10 = scalar_select %p177_p1, %s2692_s26, %s179_s8  }
   0x9   : > { %p2779_p5 = por %p190_p2, %p189_p0  ;;  %p2783_p6 = por %p196_p4, %p195_p3 }
   0xa   : > { %p2087_p7 = scmp.ge.s32.totalorder %s2696_s27, 1  ;;  %p241_p8 = scmp.lt.s32.totalorder %s2696_s27, 3 }
   0xc   : > { %p242_p9 = pnand %p2087_p7, %p241_p8 }
   0xd   : > { %s2089_s15 = sshll.u32 (!%p242_p9), %s2762_s28, 6  ;;  %s270_s9 = sand.u32 (!%p242_p9), 1, %s2688_s25  }
   0xe   : > { %245 = sbr.rel (%p242_p9) target bundleno = 771 (0x303), region = 48  ;;  %p274_p10 = scmp.lt.s32.totalorder (!%p242_p9), %s2089_s15, 127 }
   0xf   : > { %s2088_s13 = sshll.u32 (!%p242_p9), %s270_s9, 9  ;;  %s2235_s17 = sshll.u32 (!%p242_p9), %s2762_s28, 13 }
  0x10   : > { %s3157_s16 = scalar_lea.vmem (!%p242_p9), [#allocation2], %s2088_s13  ;;  %s3297_s28 = scalar_lea.sflag (!%p242_p9), [#allocation3], %s270_s9 }
  0x11   : > { %s2698_s23 = smov (!%p242_p9), [#allocation2]  }
  0x12   : > { %s2640_s29 = sshll.u32 (!%p242_p9), %s2698_s23, 4  ;;  %s2641_s29 = int_to_ptr.vmem [resolvable:$false] %s2640_s29 }
  0x13   : > { %v345_v0 = vld [vmem:[%s3338_s1] sm:$0xf]  ;;  %vm610_vm0 = vcmask 1043456   ;;  %v2628_v1 = vld [vmem:[%s3340_s3 + $0x18] sm:$0xff]   ;;  %s3352_s15 = smov (!%p274_p10, %s2089_s15), 127  ;;  %vm513_vm1 = vcmask 64512  }
  0x14   : > { %2553 = vmatprep.subr.msk.bf16.mxu0 %vm610_vm0, %v345_v0  ;;  %v612_v2 = vsel %vm610_vm0, %v345_v0, 0  ;;  %2554 = vmatprep.subr.msk.bf16.mxu1 %vm610_vm0, %v345_v0  ;;  %s2090_s18 = sshll.u32 %s3352_s15, 2  ;;  %v2629_v11 = vld [vmem:[%s3340_s3 + $0x10] sm:$0xff]   ;;  %v2630_v14 = vld [vmem:[%s3340_s3 + $0x8] sm:$0xff]   ;;  %v2631_v19 = vld [vmem:[%s3340_s3] sm:$0xff]   ;;  %vm1038_vm2 = vcmask 523264  }
  0x15   : > { %2342 = vmatpush3.bf16.msra.mxu0 %v612_v2  ;;  %2552 = vmatpush3.bf16.msra.mxu1 %v612_v2  ;;  %s2799_s21 = scalar_lea.vmem %s3337_s0, %s2090_s18  ;;  %v2877_v40 = vld [vmem:[%s3339_s2] ss:$0 sm:$0xff]  ;;  %v2632_v46 = vld [vmem:[%s3342_s5 + $0x18] sm:$0xff]   ;;  %v2633_v47 = vld [vmem:[%s3342_s5 + $0x10] sm:$0xff]   ;;  %s2022_s18 = sshll.u32 %s3157_s16, 4  ;;  %s3290_s18 = int_to_ptr.vmem [resolvable:$true] %s2022_s18 }
  0x16   : > { %2407 = vmatprep.subr.bf16.mxu1 %v2628_v1  ;;  %v2596_v3 = vld [vmem:[%s2799_s21] sm:$0xff]   ;;  %v2597_v4 = vld [vmem:[%s2799_s21 + $0x8] sm:$0xff]   ;;  %v2598_v5 = vld [vmem:[%s2799_s21 + $0x10] sm:$0xff]   ;;  %2479 = vmatprep.subr.bf16.mxu0 %v2632_v46  ;;  %s2636_s22 = scalar_lea.vmem %s3290_s18, 8192  ;;  %s2642_s8 = scalar_lea.vmem %s2641_s29, 16384 }
  0x17   : > { %2343 = vmatprep.mubr.msk.bf16.mxu0 %vm513_vm1, %v2596_v3  ;;  %v2599_v6 = vld [vmem:[%s2799_s21 + $0x18] sm:$0xff]   ;;  %v2600_v7 = vld [vmem:[%s2799_s21 + $0x20] sm:$0xff]   ;;  %v2601_v8 = vld [vmem:[%s2799_s21 + $0x28] sm:$0xff]   ;;  %p2637_p11 = scmp.ne.s32.totalorder %s3290_s18, %s2636_s22  ;;  %p2643_p0 = scmp.lt.s32.totalorder %s3290_s18, %s2641_s29 }
  0x18   : > { %2344 = vmatmul.mubr.msk.bf16.vlgmr.msra.gmra.mxu0 %vm513_vm1, %v2597_v4  ;;  %v2602_v9 = vld [vmem:[%s2799_s21 + $0x30] sm:$0xff]   ;;  %v2612_v10 = vld [vmem:[%s2799_s21 + $0x80] sm:$0xff]   ;;  %v2613_v12 = vld [vmem:[%s2799_s21 + $0x88] sm:$0xff]   ;;  %p2644_p1 = scmp.lt.s32.totalorder %s2642_s8, %s2636_s22 }
  0x19   : > { %2347 = vmatprep.mubr.msk.bf16.mxu0 %vm513_vm1, %v2598_v5  ;;  %2375 = vmatprep.mubr.msk.bf16.mxu1 %vm513_vm1, %v2612_v10  ;;  %v2614_v13 = vld [vmem:[%s2799_s21 + $0x90] sm:$0xff]   ;;  %v2603_v15 = vld [vmem:[%s2799_s21 + $0x38] sm:$0xff]   ;;  %v2604_v16 = vld [vmem:[%s2799_s21 + $0x40] sm:$0xff]   ;;  %p2638_p12 = pnand %p2637_p11, %p2779_p5 }
  0x1a   : > { %2376 = vmatmul.mubr.msk.bf16.vlgmr.msra.gmra.mxu1 %vm513_vm1, %v2613_v12  ;;  %v2615_v17 = vld [vmem:[%s2799_s21 + $0x98] sm:$0xff]   ;;  %v2616_v18 = vld [vmem:[%s2799_s21 + $0xa0] sm:$0xff]   ;;  %v2605_v20 = vld [vmem:[%s2799_s21 + $0x48] sm:$0xff]   ;;  %2480 = vmatpush3.bf16.msra.mxu0 %v2632_v46  ;;  %p2645_p2 = por %p2644_p1, %p2643_p0 }
  0x1b   : > { %2379 = vmatprep.mubr.msk.bf16.mxu1 %vm513_vm1, %v2614_v13  ;;  %2408 = vmatpush3.bf16.msra.mxu1 %v2628_v1  ;;  %v2606_v21 = vld [vmem:[%s2799_s21 + $0x50] sm:$0xff]   ;;  %v2617_v22 = vld [vmem:[%s2799_s21 + $0xa8] sm:$0xff]   ;;  %v2607_v24 = vld [vmem:[%s2799_s21 + $0x58] sm:$0xff]   ;;  %p2639_p13 = pneg %p2638_p12 }
  0x1c   : > { %2409 = vmatprep.subr.bf16.mxu1 %v2629_v11  ;;  %v2618_v23 = vld [vmem:[%s2799_s21 + $0xb0] sm:$0xff]   ;;  %v2619_v25 = vld [vmem:[%s2799_s21 + $0xb8] sm:$0xff]   ;;  %v2608_v26 = vld [vmem:[%s2799_s21 + $0x60] sm:$0xff]   ;;  %2481 = vmatprep.subr.bf16.mxu0 %v2633_v47 }
  0x1d   : > { %v2620_v27 = vld [vmem:[%s2799_s21 + $0xc0] sm:$0xff]   ;;  %v2609_v28 = vld [vmem:[%s2799_s21 + $0x68] sm:$0xff]   ;;  %v2610_v30 = vld [vmem:[%s2799_s21 + $0x70] sm:$0xff]   ;;  %p2646_p3 = pnand %p2645_p2, %p2639_p13 }
  0x1e   : > { %v2621_v29 = vld [vmem:[%s2799_s21 + $0xc8] sm:$0xff]   ;;  %v2622_v31 = vld [vmem:[%s2799_s21 + $0xd0] sm:$0xff]   ;;  %v2611_v32 = vld [vmem:[%s2799_s21 + $0x78] sm:$0xff]   ;;  %2482 = vmatpush3.bf16.msra.mxu0 %v2633_v47 }
  0x1f   : > { %2410 = vmatpush3.bf16.msra.mxu1 %v2629_v11  ;;  %v2623_v33 = vld [vmem:[%s2799_s21 + $0xd8] sm:$0xff]   ;;  %v2624_v34 = vld [vmem:[%s2799_s21 + $0xe0] sm:$0xff]   ;;  %v2625_v35 = vld [vmem:[%s2799_s21 + $0xe8] sm:$0xff]  }
  0x20   : > { %2348 = vmatmul.mubr.msk.bf16.gmra.mxu0 %vm513_vm1, %v2599_v6  ;;  %2411 = vmatprep.subr.bf16.mxu1 %v2630_v14  ;;  %v2626_v36 = vld [vmem:[%s2799_s21 + $0xf0] sm:$0xff]   ;;  %v2627_v37 = vld [vmem:[%s2799_s21 + $0xf8] sm:$0xff]   ;;  %v2634_v55 = vld [vmem:[%s3342_s5 + $0x8] sm:$0xff]   ;;  %s3288_s21 = scalar_lea.hbm %s3344_s7, %s2235_s17 }
  0x21   : > { %2351 = vmatprep.mubr.msk.bf16.mxu0 %vm513_vm1, %v2600_v7  ;;  %2483 = vmatprep.subr.bf16.mxu0 %v2634_v55  ;;  %v2635_v63 = vld [vmem:[%s3342_s5] sm:$0xff]  }
  0x22   : > { %2380 = vmatmul.mubr.msk.bf16.gmra.mxu1 %vm513_vm1, %v2615_v17  ;;  %2484 = vmatpush3.bf16.msra.mxu0 %v2634_v55 }
  0x23   : > { %2383 = vmatprep.mubr.msk.bf16.mxu1 %vm513_vm1, %v2616_v18  ;;  %2412 = vmatpush3.bf16.msra.mxu1 %v2630_v14 }
  0x24   : > { %2413 = vmatprep.subr.bf16.mxu1 %v2631_v19  ;;  %2485 = vmatprep.subr.bf16.mxu0 %v2635_v63 }
  0x26   : > { %2486 = vmatpush3.bf16.msra.mxu0 %v2635_v63 }
  0x27   : > { %2414 = vmatpush3.bf16.msra.mxu1 %v2631_v19 }
  0x28   : > { %2352 = vmatmul.mubr.msk.bf16.gmra.mxu0 %vm513_vm1, %v2601_v8 }
  0x29   : > { %2355 = vmatprep.mubr.msk.bf16.mxu0 %vm513_vm1, %v2602_v9 }
  0x2a   : > { %2384 = vmatmul.mubr.msk.bf16.gmra.mxu1 %vm513_vm1, %v2617_v22 }
  0x2b   : > { %2387 = vmatprep.mubr.msk.bf16.mxu1 %vm513_vm1, %v2618_v23 }
  0x30   : > { %2356 = vmatmul.mubr.msk.bf16.gmra.mxu0 %vm513_vm1, %v2603_v15 }
  0x31   : > { %2359 = vmatprep.mubr.msk.bf16.mxu0 %vm513_vm1, %v2604_v16 }
  0x32   : > { %2388 = vmatmul.mubr.msk.bf16.gmra.mxu1 %vm513_vm1, %v2619_v25 }
  0x33   : > { %2391 = vmatprep.mubr.msk.bf16.mxu1 %vm513_vm1, %v2620_v27 }
  0x38   : > { %2360 = vmatmul.mubr.msk.bf16.gmra.mxu0 %vm513_vm1, %v2605_v20 }
  0x39   : > { %2363 = vmatprep.mubr.msk.bf16.mxu0 %vm513_vm1, %v2606_v21 }
  0x3a   : > { %2392 = vmatmul.mubr.msk.bf16.gmra.mxu1 %vm513_vm1, %v2621_v29 }
  0x3b   : > { %2395 = vmatprep.mubr.msk.bf16.mxu1 %vm513_vm1, %v2622_v31 }
  0x40   : > { %2364 = vmatmul.mubr.msk.bf16.gmra.mxu0 %vm513_vm1, %v2607_v24 }
  0x41   : > { %2367 = vmatprep.mubr.msk.bf16.mxu0 %vm513_vm1, %v2608_v26 }
  0x42   : > { %2396 = vmatmul.mubr.msk.bf16.gmra.mxu1 %vm513_vm1, %v2623_v33 }
  0x43   : > { %2399 = vmatprep.mubr.msk.bf16.mxu1 %vm513_vm1, %v2624_v34 }
  0x48   : > { %2368 = vmatmul.mubr.msk.bf16.gmra.mxu0 %vm513_vm1, %v2609_v28 }
  0x49   : > { %2371 = vmatprep.mubr.msk.bf16.mxu0 %vm513_vm1, %v2610_v30 }
  0x4a   : > { %2400 = vmatmul.mubr.msk.bf16.gmra.mxu1 %vm513_vm1, %v2625_v35 }
  0x4b   : > { %2403 = vmatprep.mubr.msk.bf16.mxu1 %vm513_vm1, %v2626_v36 }
  0x50   : > { %2372 = vmatmul.mubr.msk.bf16.gmra.mxu0 %vm513_vm1, %v2611_v32 }
  0x52   : > { %2404 = vmatmul.mubr.msk.bf16.gmra.mxu1 %vm513_vm1, %v2627_v37 }
  0xd8   : > { %v2345_v38 = vpop.f32.mrf.mxu0 }
  0xd9   : > { %v657_v44 = vadd.f32 %v2345_v38, %v2877_v40 }
  0xda   : > { %v648_v39 = vpop.f32.mrf.mxu0  ;;  %v2901_v3 = vpop.f32.mrf.mxu1 }
  0xdb   : > { %v649_v42 = vadd.f32 %v2877_v40, %v648_v39  ;;  %v905_v53 = vmax.f32 %v657_v44, 0.0 }
  0xdc   : > { %v2346_v41 = vpop.f32.mrf.mxu0  ;;  %v2903_v8 = vpop.f32.mrf.mxu1 }
  0xdd   : > { %v660_v43 = vadd.f32 %v2346_v41, %v2877_v40  ;;  %v903_v51 = vmax.f32 %v649_v42, 0.0 }
  0xde   : > { %v651_v45 = vpop.f32.mrf.mxu0  ;;  %v2905_v12 = vpop.f32.mrf.mxu1 }
  0xdf   : > { %v652_v48 = vadd.f32 %v2877_v40, %v651_v45  ;;  %v906_v49 = vmax.f32 %v660_v43, 0.0 }
  0xe0   : > { %v2349_v50 = vpop.f32.mrf.mxu0  ;;  %v2912_v17 = vpop.f32.mrf.mxu1 }
  0xe1   : > { %v904_v52 = vmax.f32 %v652_v48, 0.0  ;;  %v968_v57 = vpack.c.bf16 %v906_v49, %v905_v53  ;;  %v673_v61 = vadd.f32 %v2349_v50, %v2877_v40 }
  0xe2   : > { %v664_v54 = vpop.f32.mrf.mxu0  ;;  %v2915_v21 = vpop.f32.mrf.mxu1 }
  0xe3   : > { %v967_v56 = vpack.c.bf16 %v904_v52, %v903_v51  ;;  %v665_v59 = vadd.f32 %v2877_v40, %v664_v54  ;;  %v909_v6 = vmax.f32 %v673_v61, 0.0 }
  0xe4   : > { %v2350_v58 = vpop.f32.mrf.mxu0  ;;  %v2917_v26 = vpop.f32.mrf.mxu1 }
  0xe5   : > { %v676_v60 = vadd.f32 %v2350_v58, %v2877_v40  ;;  %2415 = vmatprep.mubr.msk.bf16.mxu1 %vm1038_vm2, %v967_v56  ;;  %v907_v4 = vmax.f32 %v665_v59, 0.0 }
  0xe6   : > { %v667_v62 = vpop.f32.mrf.mxu0  ;;  %2416 = vmatmul.mubr.msk.bf16.vlgmr.msra.gmra.mxu1 %vm1038_vm2, %v968_v57  ;;  %v2919_v30 = vpop.f32.mrf.mxu1 }
  0xe7   : > { %v668_v0 = vadd.f32 %v2877_v40, %v667_v62  ;;  %v910_v1 = vmax.f32 %v676_v60, 0.0 }
  0xe8   : > { %v2353_v2 = vpop.f32.mrf.mxu0  ;;  %v2926_v35 = vpop.f32.mrf.mxu1 }
  0xe9   : > { %v908_v5 = vmax.f32 %v668_v0, 0.0  ;;  %v970_v10 = vpack.c.bf16 %v910_v1, %v909_v6  ;;  %v689_v15 = vadd.f32 %v2353_v2, %v2877_v40 }
  0xea   : > { %v680_v7 = vpop.f32.mrf.mxu0  ;;  %v2929_v39 = vpop.f32.mrf.mxu1 }
  0xeb   : > { %v969_v9 = vpack.c.bf16 %v908_v5, %v907_v4  ;;  %v681_v13 = vadd.f32 %v2877_v40, %v680_v7  ;;  %v913_v24 = vmax.f32 %v689_v15, 0.0 }
  0xec   : > { %v2354_v11 = vpop.f32.mrf.mxu0  ;;  %v2931_v45 = vpop.f32.mrf.mxu1 }
  0xed   : > { %v692_v14 = vadd.f32 %v2354_v11, %v2877_v40  ;;  %2419 = vmatprep.mubr.msk.bf16.mxu1 %vm1038_vm2, %v969_v9  ;;  %v911_v22 = vmax.f32 %v681_v13, 0.0 }
  0xee   : > { %v683_v16 = vpop.f32.mrf.mxu0  ;;  %2420 = vmatmul.mubr.msk.bf16.gmra.mxu1 %vm1038_vm2, %v970_v10  ;;  %v2933_v49 = vpop.f32.mrf.mxu1 }
  0xef   : > { %v684_v18 = vadd.f32 %v2877_v40, %v683_v16  ;;  %v914_v19 = vmax.f32 %v692_v14, 0.0 }
  0xf0   : > { %v2357_v20 = vpop.f32.mrf.mxu0  ;;  %v2940_v54 = vpop.f32.mrf.mxu1 }
  0xf1   : > { %v912_v23 = vmax.f32 %v684_v18, 0.0  ;;  %v972_v28 = vpack.c.bf16 %v914_v19, %v913_v24  ;;  %v705_v33 = vadd.f32 %v2357_v20, %v2877_v40 }
  0xf2   : > { %v696_v25 = vpop.f32.mrf.mxu0  ;;  %v2943_v58 = vpop.f32.mrf.mxu1 }
  0xf3   : > { %v971_v27 = vpack.c.bf16 %v912_v23, %v911_v22  ;;  %v697_v31 = vadd.f32 %v2877_v40, %v696_v25  ;;  %v917_v43 = vmax.f32 %v705_v33, 0.0 }
  0xf4   : > { %v2358_v29 = vpop.f32.mrf.mxu0  ;;  %v2945_v63 = vpop.f32.mrf.mxu1 }
  0xf5   : > { %v708_v32 = vadd.f32 %v2358_v29, %v2877_v40  ;;  %2423 = vmatprep.mubr.msk.bf16.mxu1 %vm1038_vm2, %v971_v27  ;;  %v915_v41 = vmax.f32 %v697_v31, 0.0 }
  0xf6   : > { %v699_v34 = vpop.f32.mrf.mxu0  ;;  %2424 = vmatmul.mubr.msk.bf16.gmra.mxu1 %vm1038_vm2, %v972_v28  ;;  %v2947_v4 = vpop.f32.mrf.mxu1 }
  0xf7   : > { %v700_v36 = vadd.f32 %v2877_v40, %v699_v34  ;;  %v918_v37 = vmax.f32 %v708_v32, 0.0 }
  0xf8   : > { %v2361_v38 = vpop.f32.mrf.mxu0  ;;  %v2955_v14 = vpop.f32.mrf.mxu1 }
  0xf9   : > { %v916_v42 = vmax.f32 %v700_v36, 0.0  ;;  %v974_v47 = vpack.c.bf16 %v918_v37, %v917_v43  ;;  %v721_v52 = vadd.f32 %v2361_v38, %v2877_v40  ;;  %v777_v43 = vadd.f32 %v2877_v40, %v2903_v8 }
  0xfa   : > { %v712_v44 = vpop.f32.mrf.mxu0  ;;  %v2957_v24 = vpop.f32.mrf.mxu1 }
  0xfb   : > { %v973_v46 = vpack.c.bf16 %v916_v42, %v915_v41  ;;  %v713_v50 = vadd.f32 %v2877_v40, %v712_v44  ;;  %v921_v61 = vmax.f32 %v721_v52, 0.0  ;;  %v780_v44 = vadd.f32 %v2877_v40, %v2912_v17 }
  0xfc   : > { %v2362_v48 = vpop.f32.mrf.mxu0  ;;  %v2965_v34 = vpop.f32.mrf.mxu1 }
  0xfd   : > { %v724_v51 = vadd.f32 %v2362_v48, %v2877_v40  ;;  %2427 = vmatprep.mubr.msk.bf16.mxu1 %vm1038_vm2, %v973_v46  ;;  %v919_v59 = vmax.f32 %v713_v50, 0.0 }
  0xfe   : > { %v715_v53 = vpop.f32.mrf.mxu0  ;;  %2428 = vmatmul.mubr.msk.bf16.gmra.mxu1 %vm1038_vm2, %v974_v47  ;;  %v2971_v48 = vpop.f32.mrf.mxu1 }
  0xff   : > { %v716_v55 = vadd.f32 %v2877_v40, %v715_v53  ;;  %v922_v56 = vmax.f32 %v724_v51, 0.0 }
 0x100   : > { %v2365_v57 = vpop.f32.mrf.mxu0 }
 0x101   : > { %v920_v60 = vmax.f32 %v716_v55, 0.0  ;;  %v976_v1 = vpack.c.bf16 %v922_v56, %v921_v61  ;;  %v737_v7 = vadd.f32 %v2365_v57, %v2877_v40  ;;  %v935_v55 = vmax.f32 %v777_v43, 0.0  ;;  %v843_v57 = vpop.f32.mrf.mxu1 }
 0x102   : > { %v728_v62 = vpop.f32.mrf.mxu0  ;;  %v936_v56 = vmax.f32 %v780_v44, 0.0  ;;  %v836_v43 = vadd.f32 %v2947_v4, %v2877_v40  ;;  %v852_v4 = vadd.f32 %v2971_v48, %v2877_v40 }
 0x103   : > { %v975_v0 = vpack.c.bf16 %v920_v60, %v919_v59  ;;  %v729_v5 = vadd.f32 %v2877_v40, %v728_v62  ;;  %v925_v18 = vmax.f32 %v737_v7, 0.0  ;;  %v788_v7 = vadd.f32 %v2905_v12, %v2877_v40 }
 0x104   : > { %v2366_v2 = vpop.f32.mrf.mxu0  ;;  %v812_v12 = vadd.f32 %v2877_v40, %v2940_v54  ;;  %v825_v54 = vadd.f32 %v2877_v40, %v2945_v63 }
 0x105   : > { %v740_v6 = vadd.f32 %v2366_v2, %v2877_v40  ;;  %2431 = vmatprep.mubr.msk.bf16.mxu1 %vm1038_vm2, %v975_v0  ;;  %v923_v15 = vmax.f32 %v729_v5, 0.0  ;;  %v983_v0 = vpack.c.bf16 %v936_v56, %v935_v55  ;;  %v796_v2 = vadd.f32 %v2877_v40, %v2926_v35 }
 0x106   : > { %v731_v9 = vpop.f32.mrf.mxu0  ;;  %2432 = vmatmul.mubr.msk.bf16.gmra.mxu1 %vm1038_vm2, %v976_v1  ;;  %v793_v1 = vadd.f32 %v2877_v40, %v2917_v26  ;;  %v785_v5 = vadd.f32 %v2901_v3, %v2877_v40  ;;  %v809_v3 = vadd.f32 %v2877_v40, %v2931_v45 }
 0x107   : > { %v732_v10 = vadd.f32 %v2877_v40, %v731_v9  ;;  %v926_v11 = vmax.f32 %v740_v6, 0.0  ;;  %v2987_v9 = vpop.f32.mrf.mxu1  ;;  %v940_v26 = vmax.f32 %v796_v2, 0.0 }
 0x108   : > { %v2369_v13 = vpop.f32.mrf.mxu0 }
 0x109   : > { %v924_v16 = vmax.f32 %v732_v10, 0.0  ;;  %v978_v22 = vpack.c.bf16 %v926_v11, %v925_v18  ;;  %v753_v28 = vadd.f32 %v2369_v13, %v2877_v40  ;;  %v939_v10 = vmax.f32 %v793_v1, 0.0  ;;  %v856_v35 = vpop.f32.mrf.mxu1 }
 0x10a   : > { %v744_v19 = vpop.f32.mrf.mxu0  ;;  %v937_v11 = vmax.f32 %v785_v5, 0.0  ;;  %v938_v13 = vmax.f32 %v788_v7, 0.0  ;;  %v801_v18 = vadd.f32 %v2915_v21, %v2877_v40  ;;  %v828_v21 = vadd.f32 %v2877_v40, %v2955_v14 }
 0x10b   : > { %v977_v20 = vpack.c.bf16 %v924_v16, %v923_v15  ;;  %v745_v25 = vadd.f32 %v2877_v40, %v744_v19  ;;  %v929_v38 = vmax.f32 %v753_v28, 0.0  ;;  %v985_v15 = vpack.c.bf16 %v940_v26, %v939_v10 }
 0x10c   : > { %v2370_v23 = vpop.f32.mrf.mxu0  ;;  %v984_v16 = vpack.c.bf16 %v938_v13, %v937_v11  ;;  %v804_v19 = vadd.f32 %v2919_v30, %v2877_v40  ;;  %v817_v30 = vadd.f32 %v2929_v39, %v2877_v40  ;;  %v841_v14 = vadd.f32 %v2877_v40, %v2965_v34 }
 0x10d   : > { %v756_v27 = vadd.f32 %v2370_v23, %v2877_v40  ;;  %2435 = vmatprep.mubr.msk.bf16.mxu1 %vm1038_vm2, %v977_v20  ;;  %v927_v36 = vmax.f32 %v745_v25, 0.0  ;;  %v2398_v20 = vpop.f32.mrf.mxu1  ;;  %v944_v23 = vmax.f32 %v812_v12, 0.0  ;;  %v941_v25 = vmax.f32 %v801_v18, 0.0 }
 0x10e   : > { %v747_v29 = vpop.f32.mrf.mxu0  ;;  %2436 = vmatmul.mubr.msk.bf16.gmra.mxu1 %vm1038_vm2, %v978_v22  ;;  %v943_v22 = vmax.f32 %v809_v3, 0.0  ;;  %v868_v48 = vadd.f32 %v2398_v20, %v2877_v40 }
 0x10f   : > { %v748_v31 = vadd.f32 %v2877_v40, %v747_v29  ;;  %v930_v32 = vmax.f32 %v756_v27, 0.0  ;;  %v942_v27 = vmax.f32 %v804_v19, 0.0  ;;  %v859_v45 = vpop.f32.mrf.mxu1 }
 0x110   : > { %v2373_v33 = vpop.f32.mrf.mxu0  ;;  %v987_v28 = vpack.c.bf16 %v944_v23, %v943_v22  ;;  %v860_v55 = vadd.f32 %v2877_v40, %v859_v45  ;;  %v958_v26 = vmax.f32 %v868_v48, 0.0 }
 0x111   : > { %v928_v37 = vmax.f32 %v748_v31, 0.0  ;;  %v980_v46 = vpack.c.bf16 %v930_v32, %v929_v38  ;;  %v769_v52 = vadd.f32 %v2373_v33, %v2877_v40  ;;  %v986_v29 = vpack.c.bf16 %v942_v27, %v941_v25  ;;  %v2401_v32 = vpop.f32.mrf.mxu1 }
 0x112   : > { %v760_v41 = vpop.f32.mrf.mxu0  ;;  %v820_v31 = vadd.f32 %v2933_v49, %v2877_v40  ;;  %v947_v33 = vmax.f32 %v825_v54, 0.0  ;;  %v833_v49 = vadd.f32 %v2943_v58, %v2877_v40  ;;  %v849_v58 = vadd.f32 %v2957_v24, %v2877_v40 }
 0x113   : > { %v979_v42 = vpack.c.bf16 %v928_v37, %v927_v36  ;;  %v761_v50 = vadd.f32 %v2877_v40, %v760_v41  ;;  %v933_v61 = vmax.f32 %v769_v52, 0.0  ;;  %v948_v36 = vmax.f32 %v828_v21, 0.0  ;;  %v872_v63 = vpop.f32.mrf.mxu1 }
 0x114   : > { %v2374_v47 = vpop.f32.mrf.mxu0  ;;  %v945_v37 = vmax.f32 %v817_v30, 0.0  ;;  %v946_v38 = vmax.f32 %v820_v31, 0.0  ;;  %v865_v24 = vadd.f32 %v2987_v9, %v2877_v40  ;;  %v881_v9 = vadd.f32 %v2401_v32, %v2877_v40  ;;  %v3050_v30 = vld [vmem:[%s3341_s4] ss:$0 sm:$0xff] }
 0x115   : > { %v772_v51 = vadd.f32 %v2374_v47, %v2877_v40  ;;  %2439 = vmatprep.mubr.msk.bf16.mxu1 %vm1038_vm2, %v979_v42  ;;  %v931_v59 = vmax.f32 %v761_v50, 0.0  ;;  %v989_v41 = vpack.c.bf16 %v948_v36, %v947_v33  ;;  %v844_v42 = vadd.f32 %v2877_v40, %v843_v57  ;;  %v2402_v44 = vpop.f32.mrf.mxu1 }
 0x116   : > { %v763_v53 = vpop.f32.mrf.mxu0  ;;  %2440 = vmatmul.mubr.msk.bf16.gmra.mxu1 %vm1038_vm2, %v980_v46  ;;  %v988_v39 = vpack.c.bf16 %v946_v38, %v945_v37  ;;  %v951_v46 = vmax.f32 %v841_v14, 0.0  ;;  %v949_v50 = vmax.f32 %v833_v49, 0.0  ;;  %v956_v57 = vmax.f32 %v860_v55, 0.0 }
 0x117   : > { %v764_v8 = vadd.f32 %v2877_v40, %v763_v53  ;;  %v934_v17 = vmax.f32 %v772_v51, 0.0  ;;  %v952_v47 = vmax.f32 %v844_v42, 0.0  ;;  %v950_v51 = vmax.f32 %v836_v43, 0.0  ;;  %v875_v52 = vpop.f32.mrf.mxu1 }
 0x118   : > { %v857_v53 = vadd.f32 %v2877_v40, %v856_v35  ;;  %v876_v1 = vadd.f32 %v2877_v40, %v875_v52  ;;  %v957_v10 = vmax.f32 %v865_v24, 0.0  ;;  %v884_v12 = vadd.f32 %v2402_v44, %v2877_v40 }
 0x119   : > { %v932_v60 = vmax.f32 %v764_v8, 0.0  ;;  %v982_v6 = vpack.c.bf16 %v934_v17, %v933_v61  ;;  %v991_v34 = vpack.c.bf16 %v952_v47, %v951_v46  ;;  %v990_v8 = vpack.c.bf16 %v950_v51, %v949_v50  ;;  %v2405_v56 = vpop.f32.mrf.mxu1 }
 0x11a   : > { %v955_v17 = vmax.f32 %v857_v53, 0.0  ;;  %v960_v7 = vmax.f32 %v876_v1, 0.0  ;;  %v994_v3 = vpack.c.bf16 %v958_v26, %v957_v10  ;;  %v961_v19 = vmax.f32 %v881_v9, 0.0 }
 0x11b   : > { %v981_v62 = vpack.c.bf16 %v932_v60, %v931_v59  ;;  %v953_v59 = vmax.f32 %v849_v58, 0.0  ;;  %v954_v60 = vmax.f32 %v852_v4, 0.0  ;;  %v888_v61 = vpop.f32.mrf.mxu1  ;;  %v962_v20 = vmax.f32 %v884_v12, 0.0 }
 0x11c   : > { %v889_v35 = vadd.f32 %v2877_v40, %v888_v61  ;;  %v897_v25 = vadd.f32 %v2405_v56, %v2877_v40 }
 0x11d   : > { %2443 = vmatprep.mubr.msk.bf16.mxu1 %vm1038_vm2, %v981_v62  ;;  %v993_v62 = vpack.c.bf16 %v956_v57, %v955_v17  ;;  %v992_v2 = vpack.c.bf16 %v954_v60, %v953_v59  ;;  %v2406_v5 = vpop.f32.mrf.mxu1  ;;  %v996_v23 = vpack.c.bf16 %v962_v20, %v961_v19 }
 0x11e   : > { %2444 = vmatmul.mubr.msk.bf16.gmra.mxu1 %vm1038_vm2, %v982_v6  ;;  %v900_v27 = vadd.f32 %v2406_v5, %v2877_v40  ;;  %v965_v45 = vmax.f32 %v897_v25, 0.0 }
 0x11f   : > { %2447 = vmatprep.mubr.msk.bf16.mxu1 %vm1038_vm2, %v983_v0  ;;  %v873_v0 = vadd.f32 %v2877_v40, %v872_v63  ;;  %v891_v11 = vpop.f32.mrf.mxu1 }
 0x121   : > { %v959_v6 = vmax.f32 %v873_v0, 0.0 }
 0x123   : > { %v995_v13 = vpack.c.bf16 %v960_v7, %v959_v6 }
 0x126   : > { %2448 = vmatmul.mubr.msk.bf16.gmra.mxu1 %vm1038_vm2, %v984_v16  ;;  %v963_v16 = vmax.f32 %v889_v35, 0.0 }
 0x127   : > { %2451 = vmatprep.mubr.msk.bf16.mxu1 %vm1038_vm2, %v985_v15  ;;  %v892_v15 = vadd.f32 %v2877_v40, %v891_v11 }
 0x129   : > { %v964_v18 = vmax.f32 %v892_v15, 0.0 }
 0x12b   : > { %v997_v22 = vpack.c.bf16 %v964_v18, %v963_v16 }
 0x12e   : > { %2452 = vmatmul.mubr.msk.bf16.gmra.mxu1 %vm1038_vm2, %v986_v29 }
 0x12f   : > { %2455 = vmatprep.mubr.msk.bf16.mxu1 %vm1038_vm2, %v987_v28  ;;  %v966_v28 = vmax.f32 %v900_v27, 0.0 }
 0x131   : > { %v998_v54 = vpack.c.bf16 %v966_v28, %v965_v45 }
 0x136   : > { %2456 = vmatmul.mubr.msk.bf16.gmra.mxu1 %vm1038_vm2, %v988_v39 }
 0x137   : > { %2459 = vmatprep.mubr.msk.bf16.mxu1 %vm1038_vm2, %v989_v41 }
 0x13e   : > { %2460 = vmatmul.mubr.msk.bf16.gmra.mxu1 %vm1038_vm2, %v990_v8 }
 0x13f   : > { %2463 = vmatprep.mubr.msk.bf16.mxu1 %vm1038_vm2, %v991_v34 }
 0x146   : > { %2464 = vmatmul.mubr.msk.bf16.gmra.mxu1 %vm1038_vm2, %v992_v2 }
 0x147   : > { %2467 = vmatprep.mubr.msk.bf16.mxu1 %vm1038_vm2, %v993_v62 }
 0x14e   : > { %2468 = vmatmul.mubr.msk.bf16.gmra.mxu1 %vm1038_vm2, %v994_v3 }
 0x14f   : > { %2471 = vmatprep.mubr.msk.bf16.mxu1 %vm1038_vm2, %v995_v13 }
 0x156   : > { %2472 = vmatmul.mubr.msk.bf16.gmra.mxu1 %vm1038_vm2, %v996_v23 }
 0x157   : > { %2475 = vmatprep.mubr.msk.bf16.mxu1 %vm1038_vm2, %v997_v22 }
 0x15e   : > { %2476 = vmatmul.mubr.msk.bf16.gmra.mxu1 %vm1038_vm2, %v998_v54 }
 0x1a6   : > { %v2417_v21 = vpop.f32.mrf.mxu1 }
 0x1a7   : > { %v1178_v33 = vadd.f32 %v2417_v21, %v3050_v30 }
 0x1a8   : > { %v1169_v29 = vpop.f32.mrf.mxu1 }
 0x1a9   : > { %v1170_v32 = vadd.f32 %v3050_v30, %v1169_v29  ;;  %v1426_v42 = vmax.f32 %v1178_v33, 0.0 }
 0x1aa   : > { %v2418_v31 = vpop.f32.mrf.mxu1 }
 0x1ab   : > { %v1181_v40 = vadd.f32 %v2418_v31, %v3050_v30  ;;  %v1424_v41 = vmax.f32 %v1170_v32, 0.0 }
 0x1ac   : > { %v1172_v36 = vpop.f32.mrf.mxu1 }
 0x1ad   : > { %v1173_v37 = vadd.f32 %v3050_v30, %v1172_v36  ;;  %v1427_v38 = vmax.f32 %v1181_v40, 0.0 }
 0x1ae   : > { %v2421_v63 = vpop.f32.mrf.mxu1 }
 0x1af   : > { %v1425_v14 = vmax.f32 %v1173_v37, 0.0  ;;  %v1489_v43 = vpack.c.bf16 %v1427_v38, %v1426_v42  ;;  %v1194_v50 = vadd.f32 %v2421_v63, %v3050_v30 }
 0x1b0   : > { %v1185_v39 = vpop.f32.mrf.mxu1 }
 0x1b1   : > { %v1488_v49 = vpack.c.bf16 %v1425_v14, %v1424_v41  ;;  %v1186_v46 = vadd.f32 %v3050_v30, %v1185_v39  ;;  %v1430_v58 = vmax.f32 %v1194_v50, 0.0 }
 0x1b2   : > { %v2422_v44 = vpop.f32.mrf.mxu1 }
 0x1b3   : > { %v1197_v47 = vadd.f32 %v2422_v44, %v3050_v30  ;;  %2487 = vmatprep.mubr.msk.bf16.mxu0 %vm1038_vm2, %v1488_v49  ;;  %v1428_v55 = vmax.f32 %v1186_v46, 0.0 }
 0x1b4   : > { %v1188_v51 = vpop.f32.mrf.mxu1  ;;  %2488 = vmatmul.mubr.msk.bf16.vlgmr.msra.gmra.mxu0 %vm1038_vm2, %v1489_v43 }
 0x1b5   : > { %v1189_v52 = vadd.f32 %v3050_v30, %v1188_v51  ;;  %v1431_v34 = vmax.f32 %v1197_v47, 0.0 }
 0x1b6   : > { %v2425_v53 = vpop.f32.mrf.mxu1 }
 0x1b7   : > { %v1429_v8 = vmax.f32 %v1189_v52, 0.0  ;;  %v1491_v17 = vpack.c.bf16 %v1431_v34, %v1430_v58  ;;  %v1210_v61 = vadd.f32 %v2425_v53, %v3050_v30 }
 0x1b8   : > { %v1201_v4 = vpop.f32.mrf.mxu1 }
 0x1b9   : > { %v1490_v56 = vpack.c.bf16 %v1429_v8, %v1428_v55  ;;  %v1202_v59 = vadd.f32 %v3050_v30, %v1201_v4  ;;  %v1434_v5 = vmax.f32 %v1210_v61, 0.0 }
 0x1ba   : > { %v2426_v57 = vpop.f32.mrf.mxu1 }
 0x1bb   : > { %v1213_v60 = vadd.f32 %v2426_v57, %v3050_v30  ;;  %2491 = vmatprep.mubr.msk.bf16.mxu0 %vm1038_vm2, %v1490_v56  ;;  %v1432_v24 = vmax.f32 %v1202_v59, 0.0 }
 0x1bc   : > { %v1204_v62 = vpop.f32.mrf.mxu1  ;;  %2492 = vmatmul.mubr.msk.bf16.gmra.mxu0 %vm1038_vm2, %v1491_v17 }
 0x1bd   : > { %v1205_v0 = vadd.f32 %v3050_v30, %v1204_v62  ;;  %v1435_v1 = vmax.f32 %v1213_v60, 0.0 }
 0x1be   : > { %v2429_v2 = vpop.f32.mrf.mxu1 }
 0x1bf   : > { %v1433_v48 = vmax.f32 %v1205_v0, 0.0  ;;  %v1493_v10 = vpack.c.bf16 %v1435_v1, %v1434_v5  ;;  %v1226_v35 = vadd.f32 %v2429_v2, %v3050_v30 }
 0x1c0   : > { %v1217_v6 = vpop.f32.mrf.mxu1 }
 0x1c1   : > { %v1492_v7 = vpack.c.bf16 %v1433_v48, %v1432_v24  ;;  %v1218_v11 = vadd.f32 %v3050_v30, %v1217_v6  ;;  %v1438_v19 = vmax.f32 %v1226_v35, 0.0 }
 0x1c2   : > { %v2430_v26 = vpop.f32.mrf.mxu1 }
 0x1c3   : > { %v1229_v13 = vadd.f32 %v2430_v26, %v3050_v30  ;;  %2495 = vmatprep.mubr.msk.bf16.mxu0 %vm1038_vm2, %v1492_v7  ;;  %v1436_v16 = vmax.f32 %v1218_v11, 0.0 }
 0x1c4   : > { %v1220_v15 = vpop.f32.mrf.mxu1  ;;  %2496 = vmatmul.mubr.msk.bf16.gmra.mxu0 %vm1038_vm2, %v1493_v10 }
 0x1c5   : > { %v1221_v3 = vadd.f32 %v3050_v30, %v1220_v15  ;;  %v1439_v9 = vmax.f32 %v1229_v13, 0.0 }
 0x1c6   : > { %v2433_v12 = vpop.f32.mrf.mxu1 }
 0x1c7   : > { %v1437_v18 = vmax.f32 %v1221_v3, 0.0  ;;  %v1495_v23 = vpack.c.bf16 %v1439_v9, %v1438_v19  ;;  %v1242_v28 = vadd.f32 %v2433_v12, %v3050_v30 }
 0x1c8   : > { %v1233_v20 = vpop.f32.mrf.mxu1 }
 0x1c9   : > { %v1494_v22 = vpack.c.bf16 %v1437_v18, %v1436_v16  ;;  %v1234_v27 = vadd.f32 %v3050_v30, %v1233_v20  ;;  %v1442_v33 = vmax.f32 %v1242_v28, 0.0 }
 0x1ca   : > { %v2434_v25 = vpop.f32.mrf.mxu1 }
 0x1cb   : > { %v1245_v45 = vadd.f32 %v2434_v25, %v3050_v30  ;;  %2499 = vmatprep.mubr.msk.bf16.mxu0 %vm1038_vm2, %v1494_v22  ;;  %v1440_v32 = vmax.f32 %v1234_v27, 0.0 }
 0x1cc   : > { %v1236_v54 = vpop.f32.mrf.mxu1  ;;  %2500 = vmatmul.mubr.msk.bf16.gmra.mxu0 %vm1038_vm2, %v1495_v23 }
 0x1cd   : > { %v1237_v21 = vadd.f32 %v3050_v30, %v1236_v54  ;;  %v1443_v29 = vmax.f32 %v1245_v45, 0.0 }
 0x1ce   : > { %v2437_v31 = vpop.f32.mrf.mxu1 }
 0x1cf   : > { %v1441_v40 = vmax.f32 %v1237_v21, 0.0  ;;  %v1497_v38 = vpack.c.bf16 %v1443_v29, %v1442_v33  ;;  %v1258_v42 = vadd.f32 %v2437_v31, %v3050_v30 }
 0x1d0   : > { %v1249_v36 = vpop.f32.mrf.mxu1 }
 0x1d1   : > { %v1496_v37 = vpack.c.bf16 %v1441_v40, %v1440_v32  ;;  %v1250_v41 = vadd.f32 %v3050_v30, %v1249_v36  ;;  %v1446_v50 = vmax.f32 %v1258_v42, 0.0 }
 0x1d2   : > { %v2438_v63 = vpop.f32.mrf.mxu1 }
 0x1d3   : > { %v1261_v14 = vadd.f32 %v2438_v63, %v3050_v30  ;;  %2503 = vmatprep.mubr.msk.bf16.mxu0 %vm1038_vm2, %v1496_v37  ;;  %v1444_v46 = vmax.f32 %v1250_v41, 0.0 }
 0x1d4   : > { %v1252_v39 = vpop.f32.mrf.mxu1  ;;  %2504 = vmatmul.mubr.msk.bf16.gmra.mxu0 %vm1038_vm2, %v1497_v38 }
 0x1d5   : > { %v1253_v49 = vadd.f32 %v3050_v30, %v1252_v39  ;;  %v1447_v43 = vmax.f32 %v1261_v14, 0.0 }
 0x1d6   : > { %v2441_v44 = vpop.f32.mrf.mxu1 }
 0x1d7   : > { %v1445_v47 = vmax.f32 %v1253_v49, 0.0  ;;  %v1499_v34 = vpack.c.bf16 %v1447_v43, %v1446_v50  ;;  %v1274_v58 = vadd.f32 %v2441_v44, %v3050_v30 }
 0x1d8   : > { %v1265_v51 = vpop.f32.mrf.mxu1 }
 0x1d9   : > { %v1498_v52 = vpack.c.bf16 %v1445_v47, %v1444_v46  ;;  %v1266_v55 = vadd.f32 %v3050_v30, %v1265_v51  ;;  %v1450_v61 = vmax.f32 %v1274_v58, 0.0 }
 0x1da   : > { %v2442_v53 = vpop.f32.mrf.mxu1 }
 0x1db   : > { %v1277_v8 = vadd.f32 %v2442_v53, %v3050_v30  ;;  %2507 = vmatprep.mubr.msk.bf16.mxu0 %vm1038_vm2, %v1498_v52  ;;  %v1448_v59 = vmax.f32 %v1266_v55, 0.0 }
 0x1dc   : > { %v1268_v4 = vpop.f32.mrf.mxu1  ;;  %2508 = vmatmul.mubr.msk.bf16.gmra.mxu0 %vm1038_vm2, %v1499_v34 }
 0x1dd   : > { %v1269_v56 = vadd.f32 %v3050_v30, %v1268_v4  ;;  %v1451_v17 = vmax.f32 %v1277_v8, 0.0 }
 0x1de   : > { %v2445_v57 = vpop.f32.mrf.mxu1 }
 0x1df   : > { %v1449_v60 = vmax.f32 %v1269_v56, 0.0  ;;  %v1501_v1 = vpack.c.bf16 %v1451_v17, %v1450_v61  ;;  %v1290_v5 = vadd.f32 %v2445_v57, %v3050_v30 }
 0x1e0   : > { %v1281_v62 = vpop.f32.mrf.mxu1 }
 0x1e1   : > { %v1500_v0 = vpack.c.bf16 %v1449_v60, %v1448_v59  ;;  %v1282_v24 = vadd.f32 %v3050_v30, %v1281_v62  ;;  %v1454_v35 = vmax.f32 %v1290_v5, 0.0 }
 0x1e2   : > { %v2446_v2 = vpop.f32.mrf.mxu1 }
 0x1e3   : > { %v1293_v48 = vadd.f32 %v2446_v2, %v3050_v30  ;;  %2511 = vmatprep.mubr.msk.bf16.mxu0 %vm1038_vm2, %v1500_v0  ;;  %v1452_v11 = vmax.f32 %v1282_v24, 0.0 }
 0x1e4   : > { %v1284_v6 = vpop.f32.mrf.mxu1  ;;  %2512 = vmatmul.mubr.msk.bf16.gmra.mxu0 %vm1038_vm2, %v1501_v1 }
 0x1e5   : > { %v1285_v7 = vadd.f32 %v3050_v30, %v1284_v6  ;;  %v1455_v10 = vmax.f32 %v1293_v48, 0.0 }
 0x1e6   : > { %v2449_v26 = vpop.f32.mrf.mxu1 }
 0x1e7   : > { %v1453_v13 = vmax.f32 %v1285_v7, 0.0  ;;  %v1503_v9 = vpack.c.bf16 %v1455_v10, %v1454_v35  ;;  %v1306_v19 = vadd.f32 %v2449_v26, %v3050_v30 }
 0x1e8   : > { %v1297_v15 = vpop.f32.mrf.mxu1 }
 0x1e9   : > { %v1502_v3 = vpack.c.bf16 %v1453_v13, %v1452_v11  ;;  %v1298_v16 = vadd.f32 %v3050_v30, %v1297_v15  ;;  %v1458_v28 = vmax.f32 %v1306_v19, 0.0 }
 0x1ea   : > { %v2450_v12 = vpop.f32.mrf.mxu1 }
 0x1eb   : > { %v1309_v18 = vadd.f32 %v2450_v12, %v3050_v30  ;;  %2515 = vmatprep.mubr.msk.bf16.mxu0 %vm1038_vm2, %v1502_v3  ;;  %v1456_v27 = vmax.f32 %v1298_v16, 0.0 }
 0x1ec   : > { %v1300_v20 = vpop.f32.mrf.mxu1  ;;  %2516 = vmatmul.mubr.msk.bf16.gmra.mxu0 %vm1038_vm2, %v1503_v9 }
 0x1ed   : > { %v1301_v22 = vadd.f32 %v3050_v30, %v1300_v20  ;;  %v1459_v23 = vmax.f32 %v1309_v18, 0.0 }
 0x1ee   : > { %v2453_v25 = vpop.f32.mrf.mxu1 }
 0x1ef   : > { %v1457_v45 = vmax.f32 %v1301_v22, 0.0  ;;  %v1505_v29 = vpack.c.bf16 %v1459_v23, %v1458_v28  ;;  %v1322_v33 = vadd.f32 %v2453_v25, %v3050_v30 }
 0x1f0   : > { %v1313_v54 = vpop.f32.mrf.mxu1 }
 0x1f1   : > { %v1504_v21 = vpack.c.bf16 %v1457_v45, %v1456_v27  ;;  %v1314_v32 = vadd.f32 %v3050_v30, %v1313_v54  ;;  %v1462_v42 = vmax.f32 %v1322_v33, 0.0 }
 0x1f2   : > { %v2454_v31 = vpop.f32.mrf.mxu1 }
 0x1f3   : > { %v1325_v40 = vadd.f32 %v2454_v31, %v3050_v30  ;;  %2519 = vmatprep.mubr.msk.bf16.mxu0 %vm1038_vm2, %v1504_v21  ;;  %v1460_v41 = vmax.f32 %v1314_v32, 0.0 }
 0x1f4   : > { %v1316_v36 = vpop.f32.mrf.mxu1  ;;  %2520 = vmatmul.mubr.msk.bf16.gmra.mxu0 %vm1038_vm2, %v1505_v29 }
 0x1f5   : > { %v1317_v37 = vadd.f32 %v3050_v30, %v1316_v36  ;;  %v1463_v38 = vmax.f32 %v1325_v40, 0.0 }
 0x1f6   : > { %v2457_v63 = vpop.f32.mrf.mxu1 }
 0x1f7   : > { %v1461_v14 = vmax.f32 %v1317_v37, 0.0  ;;  %v1507_v43 = vpack.c.bf16 %v1463_v38, %v1462_v42  ;;  %v1338_v50 = vadd.f32 %v2457_v63, %v3050_v30 }
 0x1f8   : > { %v1329_v39 = vpop.f32.mrf.mxu1 }
 0x1f9   : > { %v1506_v49 = vpack.c.bf16 %v1461_v14, %v1460_v41  ;;  %v1330_v46 = vadd.f32 %v3050_v30, %v1329_v39  ;;  %v1466_v58 = vmax.f32 %v1338_v50, 0.0 }
 0x1fa   : > { %v2458_v44 = vpop.f32.mrf.mxu1 }
 0x1fb   : > { %v1341_v47 = vadd.f32 %v2458_v44, %v3050_v30  ;;  %2523 = vmatprep.mubr.msk.bf16.mxu0 %vm1038_vm2, %v1506_v49  ;;  %v1464_v55 = vmax.f32 %v1330_v46, 0.0 }
 0x1fc   : > { %v1332_v51 = vpop.f32.mrf.mxu1  ;;  %2524 = vmatmul.mubr.msk.bf16.gmra.mxu0 %vm1038_vm2, %v1507_v43 }
 0x1fd   : > { %v1333_v52 = vadd.f32 %v3050_v30, %v1332_v51  ;;  %v1467_v34 = vmax.f32 %v1341_v47, 0.0 }
 0x1fe   : > { %v2461_v53 = vpop.f32.mrf.mxu1 }
 0x1ff   : > { %v1465_v8 = vmax.f32 %v1333_v52, 0.0  ;;  %v1509_v17 = vpack.c.bf16 %v1467_v34, %v1466_v58  ;;  %v1354_v61 = vadd.f32 %v2461_v53, %v3050_v30 }
 0x200   : > { %v1345_v4 = vpop.f32.mrf.mxu1 }
 0x201   : > { %v1508_v56 = vpack.c.bf16 %v1465_v8, %v1464_v55  ;;  %v1346_v59 = vadd.f32 %v3050_v30, %v1345_v4  ;;  %v1470_v5 = vmax.f32 %v1354_v61, 0.0 }
 0x202   : > { %v2462_v57 = vpop.f32.mrf.mxu1 }
 0x203   : > { %v1357_v60 = vadd.f32 %v2462_v57, %v3050_v30  ;;  %2527 = vmatprep.mubr.msk.bf16.mxu0 %vm1038_vm2, %v1508_v56  ;;  %v1468_v24 = vmax.f32 %v1346_v59, 0.0 }
 0x204   : > { %v1348_v62 = vpop.f32.mrf.mxu1  ;;  %2528 = vmatmul.mubr.msk.bf16.gmra.mxu0 %vm1038_vm2, %v1509_v17 }
 0x205   : > { %v1349_v0 = vadd.f32 %v3050_v30, %v1348_v62  ;;  %v1471_v1 = vmax.f32 %v1357_v60, 0.0 }
 0x206   : > { %v2465_v2 = vpop.f32.mrf.mxu1 }
 0x207   : > { %v1469_v48 = vmax.f32 %v1349_v0, 0.0  ;;  %v1511_v10 = vpack.c.bf16 %v1471_v1, %v1470_v5  ;;  %v1370_v35 = vadd.f32 %v2465_v2, %v3050_v30  ;;  %v3154_v0 = vld [vmem:[%s3343_s6] ss:$0 sm:$0xff] }
 0x208   : > { %v1361_v6 = vpop.f32.mrf.mxu1 }
 0x209   : > { %v1510_v7 = vpack.c.bf16 %v1469_v48, %v1468_v24  ;;  %v1362_v11 = vadd.f32 %v3050_v30, %v1361_v6  ;;  %v1474_v19 = vmax.f32 %v1370_v35, 0.0 }
 0x20a   : > { %v2466_v26 = vpop.f32.mrf.mxu1 }
 0x20b   : > { %v1373_v13 = vadd.f32 %v2466_v26, %v3050_v30  ;;  %2531 = vmatprep.mubr.msk.bf16.mxu0 %vm1038_vm2, %v1510_v7  ;;  %v1472_v16 = vmax.f32 %v1362_v11, 0.0 }
 0x20c   : > { %v1364_v15 = vpop.f32.mrf.mxu1  ;;  %2532 = vmatmul.mubr.msk.bf16.gmra.mxu0 %vm1038_vm2, %v1511_v10 }
 0x20d   : > { %v1365_v3 = vadd.f32 %v3050_v30, %v1364_v15  ;;  %v1475_v9 = vmax.f32 %v1373_v13, 0.0 }
 0x20e   : > { %v2469_v12 = vpop.f32.mrf.mxu1 }
 0x20f   : > { %v1473_v18 = vmax.f32 %v1365_v3, 0.0  ;;  %v1513_v23 = vpack.c.bf16 %v1475_v9, %v1474_v19  ;;  %v1386_v28 = vadd.f32 %v2469_v12, %v3050_v30 }
 0x210   : > { %v1377_v20 = vpop.f32.mrf.mxu1 }
 0x211   : > { %v1512_v22 = vpack.c.bf16 %v1473_v18, %v1472_v16  ;;  %v1378_v27 = vadd.f32 %v3050_v30, %v1377_v20  ;;  %v1478_v33 = vmax.f32 %v1386_v28, 0.0 }
 0x212   : > { %v2470_v25 = vpop.f32.mrf.mxu1 }
 0x213   : > { %v1389_v45 = vadd.f32 %v2470_v25, %v3050_v30  ;;  %2535 = vmatprep.mubr.msk.bf16.mxu0 %vm1038_vm2, %v1512_v22  ;;  %v1476_v32 = vmax.f32 %v1378_v27, 0.0 }
 0x214   : > { %v1380_v54 = vpop.f32.mrf.mxu1  ;;  %2536 = vmatmul.mubr.msk.bf16.gmra.mxu0 %vm1038_vm2, %v1513_v23 }
 0x215   : > { %v1381_v21 = vadd.f32 %v3050_v30, %v1380_v54  ;;  %v1479_v29 = vmax.f32 %v1389_v45, 0.0 }
 0x216   : > { %v2473_v31 = vpop.f32.mrf.mxu1 }
 0x217   : > { %v1477_v40 = vmax.f32 %v1381_v21, 0.0  ;;  %v1515_v38 = vpack.c.bf16 %v1479_v29, %v1478_v33  ;;  %v1402_v42 = vadd.f32 %v2473_v31, %v3050_v30 }
 0x218   : > { %v1393_v36 = vpop.f32.mrf.mxu1 }
 0x219   : > { %v1514_v37 = vpack.c.bf16 %v1477_v40, %v1476_v32  ;;  %v1394_v41 = vadd.f32 %v3050_v30, %v1393_v36  ;;  %v1482_v50 = vmax.f32 %v1402_v42, 0.0 }
 0x21a   : > { %v2474_v63 = vpop.f32.mrf.mxu1 }
 0x21b   : > { %v1405_v14 = vadd.f32 %v2474_v63, %v3050_v30  ;;  %2539 = vmatprep.mubr.msk.bf16.mxu0 %vm1038_vm2, %v1514_v37  ;;  %v1480_v46 = vmax.f32 %v1394_v41, 0.0 }
 0x21c   : > { %v1396_v39 = vpop.f32.mrf.mxu1  ;;  %2540 = vmatmul.mubr.msk.bf16.gmra.mxu0 %vm1038_vm2, %v1515_v38 }
 0x21d   : > { %v1397_v49 = vadd.f32 %v3050_v30, %v1396_v39  ;;  %v1483_v43 = vmax.f32 %v1405_v14, 0.0 }
 0x21e   : > { %v2477_v44 = vpop.f32.mrf.mxu1 }
 0x21f   : > { %v1481_v47 = vmax.f32 %v1397_v49, 0.0  ;;  %v1517_v34 = vpack.c.bf16 %v1483_v43, %v1482_v50  ;;  %v1418_v58 = vadd.f32 %v2477_v44, %v3050_v30 }
 0x220   : > { %v1409_v51 = vpop.f32.mrf.mxu1 }
 0x221   : > { %v1516_v52 = vpack.c.bf16 %v1481_v47, %v1480_v46  ;;  %v1410_v55 = vadd.f32 %v3050_v30, %v1409_v51  ;;  %v1486_v60 = vmax.f32 %v1418_v58, 0.0 }
 0x222   : > { %v2478_v53 = vpop.f32.mrf.mxu1 }
 0x223   : > { %v1421_v8 = vadd.f32 %v2478_v53, %v3050_v30  ;;  %2543 = vmatprep.mubr.msk.bf16.mxu0 %vm1038_vm2, %v1516_v52  ;;  %v1484_v57 = vmax.f32 %v1410_v55, 0.0 }
 0x224   : > { %v1412_v4 = vpop.f32.mrf.mxu1  ;;  %2544 = vmatmul.mubr.msk.bf16.gmra.mxu0 %vm1038_vm2, %v1517_v34 }
 0x225   : > { %v1413_v56 = vadd.f32 %v3050_v30, %v1412_v4  ;;  %v1487_v17 = vmax.f32 %v1421_v8, 0.0 }
 0x227   : > { %v1485_v59 = vmax.f32 %v1413_v56, 0.0  ;;  %v1519_v62 = vpack.c.bf16 %v1487_v17, %v1486_v60 }
 0x229   : > { %v1518_v61 = vpack.c.bf16 %v1485_v59, %v1484_v57 }
 0x22b   : > { %2547 = vmatprep.mubr.msk.bf16.mxu0 %vm1038_vm2, %v1518_v61 }
 0x22c   : > { %2548 = vmatmul.mubr.msk.bf16.gmra.mxu0 %vm1038_vm2, %v1519_v62 }
 0x274   : > { %v2489_v1 = vpop.f32.mrf.mxu0 }
 0x275   : > { %v1698_v30 = vadd.f32 %v2489_v1, %v3154_v0 }
 0x276   : > { %v1689_v2 = vpop.f32.mrf.mxu0 }
 0x277   : > { %1946 = vst [vmem:[%s3157_s16 + $0x10] sm:$0xff] %v1698_v30  ;;  %v1690_v24 = vadd.f32 %v3154_v0, %v1689_v2 }
 0x278   : > { %v2490_v48 = vpop.f32.mrf.mxu0 }
 0x279   : > { %1944 = vst [vmem:[%s3157_s16] sm:$0xff] %v1690_v24  ;;  %v1701_v5 = vadd.f32 %v2490_v48, %v3154_v0 }
 0x27a   : > { %v1692_v6 = vpop.f32.mrf.mxu0 }
 0x27b   : > { %1947 = vst [vmem:[%s3157_s16 + $0x18] sm:$0xff] %v1701_v5  ;;  %v1693_v7 = vadd.f32 %v3154_v0, %v1692_v6 }
 0x27c   : > { %v2493_v10 = vpop.f32.mrf.mxu0 }
 0x27d   : > { %1945 = vst [vmem:[%s3157_s16 + $0x8] sm:$0xff] %v1693_v7  ;;  %v1714_v26 = vadd.f32 %v2493_v10, %v3154_v0 }
 0x27e   : > { %v1705_v11 = vpop.f32.mrf.mxu0 }
 0x27f   : > { %1950 = vst [vmem:[%s3157_s16 + $0x30] sm:$0xff] %v1714_v26  ;;  %v1706_v13 = vadd.f32 %v3154_v0, %v1705_v11 }
 0x280   : > { %v2494_v35 = vpop.f32.mrf.mxu0 }
 0x281   : > { %1948 = vst [vmem:[%s3157_s16 + $0x20] sm:$0xff] %v1706_v13  ;;  %v1717_v15 = vadd.f32 %v2494_v35, %v3154_v0 }
 0x282   : > { %v1708_v3 = vpop.f32.mrf.mxu0 }
 0x283   : > { %1951 = vst [vmem:[%s3157_s16 + $0x38] sm:$0xff] %v1717_v15  ;;  %v1709_v9 = vadd.f32 %v3154_v0, %v1708_v3 }
 0x284   : > { %v2497_v12 = vpop.f32.mrf.mxu0 }
 0x285   : > { %1949 = vst [vmem:[%s3157_s16 + $0x28] sm:$0xff] %v1709_v9  ;;  %v1730_v16 = vadd.f32 %v2497_v12, %v3154_v0 }
 0x286   : > { %v1721_v18 = vpop.f32.mrf.mxu0 }
 0x287   : > { %1954 = vst [vmem:[%s3157_s16 + $0x50] sm:$0xff] %v1730_v16  ;;  %v1722_v19 = vadd.f32 %v3154_v0, %v1721_v18 }
 0x288   : > { %v2498_v20 = vpop.f32.mrf.mxu0 }
 0x289   : > { %1952 = vst [vmem:[%s3157_s16 + $0x40] sm:$0xff] %v1722_v19  ;;  %v1733_v22 = vadd.f32 %v2498_v20, %v3154_v0 }
 0x28a   : > { %v1724_v23 = vpop.f32.mrf.mxu0 }
 0x28b   : > { %1955 = vst [vmem:[%s3157_s16 + $0x58] sm:$0xff] %v1733_v22  ;;  %v1725_v25 = vadd.f32 %v3154_v0, %v1724_v23 }
 0x28c   : > { %v2501_v27 = vpop.f32.mrf.mxu0 }
 0x28d   : > { %1953 = vst [vmem:[%s3157_s16 + $0x48] sm:$0xff] %v1725_v25  ;;  %v1746_v45 = vadd.f32 %v2501_v27, %v3154_v0 }
 0x28e   : > { %v1737_v28 = vpop.f32.mrf.mxu0 }
 0x28f   : > { %1958 = vst [vmem:[%s3157_s16 + $0x70] sm:$0xff] %v1746_v45  ;;  %v1738_v54 = vadd.f32 %v3154_v0, %v1737_v28 }
 0x290   : > { %v2502_v21 = vpop.f32.mrf.mxu0 }
 0x291   : > { %1956 = vst [vmem:[%s3157_s16 + $0x60] sm:$0xff] %v1738_v54  ;;  %v1749_v29 = vadd.f32 %v2502_v21, %v3154_v0 }
 0x292   : > { %v1740_v31 = vpop.f32.mrf.mxu0 }
 0x293   : > { %1959 = vst [vmem:[%s3157_s16 + $0x78] sm:$0xff] %v1749_v29  ;;  %v1741_v32 = vadd.f32 %v3154_v0, %v1740_v31 }
 0x294   : > { %v2505_v40 = vpop.f32.mrf.mxu0 }
 0x295   : > { %1957 = vst [vmem:[%s3157_s16 + $0x68] sm:$0xff] %v1741_v32  ;;  %v1762_v33 = vadd.f32 %v2505_v40, %v3154_v0 }
 0x296   : > { %v1753_v36 = vpop.f32.mrf.mxu0 }
 0x297   : > { %1962 = vst [vmem:[%s3157_s16 + $0x90] sm:$0xff] %v1762_v33  ;;  %v1754_v37 = vadd.f32 %v3154_v0, %v1753_v36 }
 0x298   : > { %v2506_v38 = vpop.f32.mrf.mxu0 }
 0x299   : > { %1960 = vst [vmem:[%s3157_s16 + $0x80] sm:$0xff] %v1754_v37  ;;  %v1765_v63 = vadd.f32 %v2506_v38, %v3154_v0 }
 0x29a   : > { %v1756_v41 = vpop.f32.mrf.mxu0 }
 0x29b   : > { %1963 = vst [vmem:[%s3157_s16 + $0x98] sm:$0xff] %v1765_v63  ;;  %v1757_v14 = vadd.f32 %v3154_v0, %v1756_v41 }
 0x29c   : > { %v2509_v42 = vpop.f32.mrf.mxu0 }
 0x29d   : > { %1961 = vst [vmem:[%s3157_s16 + $0x88] sm:$0xff] %v1757_v14  ;;  %v1778_v39 = vadd.f32 %v2509_v42, %v3154_v0 }
 0x29e   : > { %v1769_v49 = vpop.f32.mrf.mxu0 }
 0x29f   : > { %1966 = vst [vmem:[%s3157_s16 + $0xb0] sm:$0xff] %v1778_v39  ;;  %v1770_v43 = vadd.f32 %v3154_v0, %v1769_v49 }
 0x2a0   : > { %v2510_v44 = vpop.f32.mrf.mxu0 }
 0x2a1   : > { %1964 = vst [vmem:[%s3157_s16 + $0xa0] sm:$0xff] %v1770_v43  ;;  %v1781_v46 = vadd.f32 %v2510_v44, %v3154_v0 }
 0x2a2   : > { %v1772_v47 = vpop.f32.mrf.mxu0 }
 0x2a3   : > { %1967 = vst [vmem:[%s3157_s16 + $0xb8] sm:$0xff] %v1781_v46  ;;  %v1773_v50 = vadd.f32 %v3154_v0, %v1772_v47 }
 0x2a4   : > { %v2513_v51 = vpop.f32.mrf.mxu0 }
 0x2a5   : > { %1965 = vst [vmem:[%s3157_s16 + $0xa8] sm:$0xff] %v1773_v50  ;;  %v1794_v52 = vadd.f32 %v2513_v51, %v3154_v0 }
 0x2a6   : > { %v1785_v34 = vpop.f32.mrf.mxu0 }
 0x2a7   : > { %1970 = vst [vmem:[%s3157_s16 + $0xd0] sm:$0xff] %v1794_v52  ;;  %v1786_v53 = vadd.f32 %v3154_v0, %v1785_v34 }
 0x2a8   : > { %v2514_v55 = vpop.f32.mrf.mxu0 }
 0x2a9   : > { %1968 = vst [vmem:[%s3157_s16 + $0xc0] sm:$0xff] %v1786_v53  ;;  %v1797_v8 = vadd.f32 %v2514_v55, %v3154_v0 }
 0x2aa   : > { %v1788_v58 = vpop.f32.mrf.mxu0 }
 0x2ab   : > { %1971 = vst [vmem:[%s3157_s16 + $0xd8] sm:$0xff] %v1797_v8  ;;  %v1789_v4 = vadd.f32 %v3154_v0, %v1788_v58 }
 0x2ac   : > { %v2517_v56 = vpop.f32.mrf.mxu0 }
 0x2ad   : > { %1969 = vst [vmem:[%s3157_s16 + $0xc8] sm:$0xff] %v1789_v4  ;;  %v1810_v17 = vadd.f32 %v2517_v56, %v3154_v0 }
 0x2ae   : > { %v1801_v57 = vpop.f32.mrf.mxu0 }
 0x2af   : > { %1974 = vst [vmem:[%s3157_s16 + $0xf0] sm:$0xff] %v1810_v17  ;;  %v1802_v59 = vadd.f32 %v3154_v0, %v1801_v57 }
 0x2b0   : > { %v2518_v60 = vpop.f32.mrf.mxu0 }
 0x2b1   : > { %1972 = vst [vmem:[%s3157_s16 + $0xe0] sm:$0xff] %v1802_v59  ;;  %v1813_v61 = vadd.f32 %v2518_v60, %v3154_v0 }
 0x2b2   : > { %v1804_v62 = vpop.f32.mrf.mxu0 }
 0x2b3   : > { %1975 = vst [vmem:[%s3157_s16 + $0xf8] sm:$0xff] %v1813_v61  ;;  %v1805_v1 = vadd.f32 %v3154_v0, %v1804_v62 }
 0x2b4   : > { %v2521_v30 = vpop.f32.mrf.mxu0 }
 0x2b5   : > { %1973 = vst [vmem:[%s3157_s16 + $0xe8] sm:$0xff] %v1805_v1  ;;  %v1826_v2 = vadd.f32 %v2521_v30, %v3154_v0 }
 0x2b6   : > { %v1817_v24 = vpop.f32.mrf.mxu0 }
 0x2b7   : > { %1978 = vst [vmem:[%s3157_s16 + $0x110] sm:$0xff] %v1826_v2  ;;  %v1818_v48 = vadd.f32 %v3154_v0, %v1817_v24 }
 0x2b8   : > { %v2522_v5 = vpop.f32.mrf.mxu0 }
 0x2b9   : > { %1976 = vst [vmem:[%s3157_s16 + $0x100] sm:$0xff] %v1818_v48  ;;  %v1829_v6 = vadd.f32 %v2522_v5, %v3154_v0 }
 0x2ba   : > { %v1820_v7 = vpop.f32.mrf.mxu0 }
 0x2bb   : > { %1979 = vst [vmem:[%s3157_s16 + $0x118] sm:$0xff] %v1829_v6  ;;  %v1821_v10 = vadd.f32 %v3154_v0, %v1820_v7 }
 0x2bc   : > { %v2525_v26 = vpop.f32.mrf.mxu0 }
 0x2bd   : > { %1977 = vst [vmem:[%s3157_s16 + $0x108] sm:$0xff] %v1821_v10  ;;  %v1842_v11 = vadd.f32 %v2525_v26, %v3154_v0 }
 0x2be   : > { %v1833_v13 = vpop.f32.mrf.mxu0 }
 0x2bf   : > { %1982 = vst [vmem:[%s3157_s16 + $0x130] sm:$0xff] %v1842_v11  ;;  %v1834_v35 = vadd.f32 %v3154_v0, %v1833_v13 }
 0x2c0   : > { %v2526_v15 = vpop.f32.mrf.mxu0 }
 0x2c1   : > { %1980 = vst [vmem:[%s3157_s16 + $0x120] sm:$0xff] %v1834_v35  ;;  %v1845_v3 = vadd.f32 %v2526_v15, %v3154_v0 }
 0x2c2   : > { %v1836_v9 = vpop.f32.mrf.mxu0 }
 0x2c3   : > { %1983 = vst [vmem:[%s3157_s16 + $0x138] sm:$0xff] %v1845_v3  ;;  %v1837_v12 = vadd.f32 %v3154_v0, %v1836_v9 }
 0x2c4   : > { %v2529_v16 = vpop.f32.mrf.mxu0 }
 0x2c5   : > { %1981 = vst [vmem:[%s3157_s16 + $0x128] sm:$0xff] %v1837_v12  ;;  %v1858_v18 = vadd.f32 %v2529_v16, %v3154_v0 }
 0x2c6   : > { %v1849_v19 = vpop.f32.mrf.mxu0 }
 0x2c7   : > { %1986 = vst [vmem:[%s3157_s16 + $0x150] sm:$0xff] %v1858_v18  ;;  %v1850_v20 = vadd.f32 %v3154_v0, %v1849_v19 }
 0x2c8   : > { %v2530_v22 = vpop.f32.mrf.mxu0 }
 0x2c9   : > { %1984 = vst [vmem:[%s3157_s16 + $0x140] sm:$0xff] %v1850_v20  ;;  %v1861_v23 = vadd.f32 %v2530_v22, %v3154_v0 }
 0x2ca   : > { %v1852_v25 = vpop.f32.mrf.mxu0 }
 0x2cb   : > { %1987 = vst [vmem:[%s3157_s16 + $0x158] sm:$0xff] %v1861_v23  ;;  %v1853_v27 = vadd.f32 %v3154_v0, %v1852_v25 }
 0x2cc   : > { %v2533_v45 = vpop.f32.mrf.mxu0 }
 0x2cd   : > { %1985 = vst [vmem:[%s3157_s16 + $0x148] sm:$0xff] %v1853_v27  ;;  %v1874_v28 = vadd.f32 %v2533_v45, %v3154_v0 }
 0x2ce   : > { %v1865_v54 = vpop.f32.mrf.mxu0 }
 0x2cf   : > { %1990 = vst [vmem:[%s3157_s16 + $0x170] sm:$0xff] %v1874_v28  ;;  %v1866_v21 = vadd.f32 %v3154_v0, %v1865_v54 }
 0x2d0   : > { %v2534_v29 = vpop.f32.mrf.mxu0 }
 0x2d1   : > { %1988 = vst [vmem:[%s3157_s16 + $0x160] sm:$0xff] %v1866_v21  ;;  %v1877_v31 = vadd.f32 %v2534_v29, %v3154_v0 }
 0x2d2   : > { %v1868_v32 = vpop.f32.mrf.mxu0 }
 0x2d3   : > { %1991 = vst [vmem:[%s3157_s16 + $0x178] sm:$0xff] %v1877_v31  ;;  %v1869_v40 = vadd.f32 %v3154_v0, %v1868_v32 }
 0x2d4   : > { %v2537_v33 = vpop.f32.mrf.mxu0 }
 0x2d5   : > { %1989 = vst [vmem:[%s3157_s16 + $0x168] sm:$0xff] %v1869_v40  ;;  %v1890_v36 = vadd.f32 %v2537_v33, %v3154_v0 }
 0x2d6   : > { %v1881_v37 = vpop.f32.mrf.mxu0 }
 0x2d7   : > { %1994 = vst [vmem:[%s3157_s16 + $0x190] sm:$0xff] %v1890_v36  ;;  %v1882_v38 = vadd.f32 %v3154_v0, %v1881_v37 }
 0x2d8   : > { %v2538_v63 = vpop.f32.mrf.mxu0 }
 0x2d9   : > { %1992 = vst [vmem:[%s3157_s16 + $0x180] sm:$0xff] %v1882_v38  ;;  %v1893_v41 = vadd.f32 %v2538_v63, %v3154_v0 }
 0x2da   : > { %v1884_v14 = vpop.f32.mrf.mxu0 }
 0x2db   : > { %1995 = vst [vmem:[%s3157_s16 + $0x198] sm:$0xff] %v1893_v41  ;;  %v1885_v42 = vadd.f32 %v3154_v0, %v1884_v14 }
 0x2dc   : > { %v2541_v39 = vpop.f32.mrf.mxu0 }
 0x2dd   : > { %1993 = vst [vmem:[%s3157_s16 + $0x188] sm:$0xff] %v1885_v42  ;;  %v1906_v49 = vadd.f32 %v2541_v39, %v3154_v0 }
 0x2de   : > { %v1897_v43 = vpop.f32.mrf.mxu0 }
 0x2df   : > { %1998 = vst [vmem:[%s3157_s16 + $0x1b0] sm:$0xff] %v1906_v49  ;;  %v1898_v44 = vadd.f32 %v3154_v0, %v1897_v43 }
 0x2e0   : > { %v2542_v46 = vpop.f32.mrf.mxu0 }
 0x2e1   : > { %1996 = vst [vmem:[%s3157_s16 + $0x1a0] sm:$0xff] %v1898_v44  ;;  %v1909_v47 = vadd.f32 %v2542_v46, %v3154_v0 }
 0x2e2   : > { %v1900_v50 = vpop.f32.mrf.mxu0 }
 0x2e3   : > { %1999 = vst [vmem:[%s3157_s16 + $0x1b8] sm:$0xff] %v1909_v47  ;;  %v1901_v51 = vadd.f32 %v3154_v0, %v1900_v50 }
 0x2e4   : > { %v2545_v52 = vpop.f32.mrf.mxu0 }
 0x2e5   : > { %1997 = vst [vmem:[%s3157_s16 + $0x1a8] sm:$0xff] %v1901_v51  ;;  %v1922_v34 = vadd.f32 %v2545_v52, %v3154_v0 }
 0x2e6   : > { %v1913_v53 = vpop.f32.mrf.mxu0 }
 0x2e7   : > { %2002 = vst [vmem:[%s3157_s16 + $0x1d0] sm:$0xff] %v1922_v34  ;;  %v1914_v55 = vadd.f32 %v3154_v0, %v1913_v53 }
 0x2e8   : > { %v2546_v8 = vpop.f32.mrf.mxu0 }
 0x2e9   : > { %2000 = vst [vmem:[%s3157_s16 + $0x1c0] sm:$0xff] %v1914_v55  ;;  %v1925_v58 = vadd.f32 %v2546_v8, %v3154_v0 }
 0x2ea   : > { %v1916_v4 = vpop.f32.mrf.mxu0 }
 0x2eb   : > { %2003 = vst [vmem:[%s3157_s16 + $0x1d8] sm:$0xff] %v1925_v58  ;;  %v1917_v56 = vadd.f32 %v3154_v0, %v1916_v4 }
 0x2ec   : > { %v2549_v17 = vpop.f32.mrf.mxu0 }
 0x2ed   : > { %2001 = vst [vmem:[%s3157_s16 + $0x1c8] sm:$0xff] %v1917_v56  ;;  %v1938_v57 = vadd.f32 %v2549_v17, %v3154_v0 }
 0x2ee   : > { %v1929_v59 = vpop.f32.mrf.mxu0 }
 0x2ef   : > { %2006 = vst [vmem:[%s3157_s16 + $0x1f0] sm:$0xff] %v1938_v57  ;;  %v1930_v60 = vadd.f32 %v3154_v0, %v1929_v59 }
 0x2f0   : > { %v2550_v61 = vpop.f32.mrf.mxu0 }
 0x2f1   : > { %2004 = vst [vmem:[%s3157_s16 + $0x1e0] sm:$0xff] %v1930_v60  ;;  %v1941_v62 = vadd.f32 %v2550_v61, %v3154_v0 }
 0x2f2   : > { %v1932_v1 = vpop.f32.mrf.mxu0 }
 0x2f3   : > { %2007 = vst [vmem:[%s3157_s16 + $0x1f8] sm:$0xff] %v1941_v62  ;;  %v1933_v30 = vadd.f32 %v3154_v0, %v1932_v1 }
 0x2f5   : > { %2005 = vst [vmem:[%s3157_s16 + $0x1e8] sm:$0xff] %v1933_v30 }
 0x2f6   : > { %2649 = shalt.err (!%p2646_p3)
}
 0x2f7   : > { %s2650_s9 = scalar_lea.hbm %s3288_s21, 8192  ;;  %s2654_s15 = scalar_lea.hbm %s3344_s7, 16384 }
 0x2f8   : > { %p2651_p4 = scmp.ne.s32.totalorder %s3288_s21, %s2650_s9  ;;  %p2655_p9 = scmp.lt.s32.totalorder %s3288_s21, %s3344_s7 }
 0x2f9   : > { %p2656_p10 = scmp.lt.s32.totalorder %s2654_s15, %s2650_s9 }
 0x2fa   : > { %p2652_p7 = pnand %p2651_p4, %p2779_p5 }
 0x2fb   : > { %p2657_p11 = por %p2656_p10, %p2655_p9 }
 0x2fc   : > { %p2653_p8 = pneg %p2652_p7 }
 0x2fe   : > { %p2658_p12 = pnand %p2657_p11, %p2653_p8 }
 0x300   : > { %2661 = shalt.err (!%p2658_p12)
}
 0x301   : > { %s2699_s19 = smov 128   ;;  %s2700_s20 = smov 8  }
 0x302   : > { %2555 = dma.vmem_to_hbm [thread:$0]  (%p2779_p5), %s3290_s18, 8192, %s3288_s21, %s3297_s28, %s2699_s19, %s2699_s19, %s2700_s20  }
 0x303 PF: > { %p2561_p13 = scmp.ge.s32.totalorder %s2696_s27, 2  ;;  %s2037_s22 = sand.u32 1, %s2684_s24  }
 0x304   : > { %s2038_s23 = scalar_lea.sflag [#allocation3], %s2037_s22 }
 0x305   : > { %p2558_p0 = pnand %p2561_p13, %p2783_p6 }
 0x307   : > { %p2559_p1 = pneg %p2558_p0 }
 0x309   : > { %2679 = dma.done.wait (%p2559_p1), %s2038_s23, 8192  }
 0x30a   : > { %2681 = vsyncadd (%p2559_p1), %s2038_s23, 4294959104  ;;  %p17_p2 = scmp.ge.s32.totalorder %s2766_s30, 4   ;;  %s3347_s24 = smov %s2688_s25 }
 0x30b   : > { %s3348_s25 = smov %s2692_s26  ;;  %s3349_s26 = smov %s2777_s10 }
 0x30c   : > { %s3350_s27 = smov %s2766_s30  ;;  %19 = sbr.rel (!%p17_p2) target bundleno = 3 (0x3), region = 83 }
 0x311   :  { %2043 = vsyncpa [#allocation3], 1 }
 0x312   :  { %2045 = vsyncpa [#allocation3 + $0x1], 1 }

</bundles_post_ra>
